<compile_context>
chip_gen: v6e
topology: v6e:2x2x1
jax: 0.10.0
libtpu: 0.0.40
codegen_flags: <defaults>
</compile_context>

<pallas_src>
import functools

import jax
import jax.numpy as jnp
import numpy as np
from jax.experimental import pallas as pl
from jax.experimental.pallas import tpu as pltpu

_NEG_BIG = -1.0e30   # plain Python float (finite: avoids -inf - -inf = NaN)


def _round_up(x, m):
    return ((x + m - 1) // m) * m


def _tpu_generation():
    """Best-effort TPU generation detection (None on CPU/interpret/unknown)."""
    try:
        kind = jax.devices()[0].device_kind.lower()
    except Exception:
        return None
    for gen in (5, 6, 7):
        if f"v{gen}" in kind or (gen == 7 and "7x" in kind):
            return gen
    return None


def _project(x_ref, wT_ref, b_ref):
    """(Bb, T, H) @ W^T + b as one flattened MXU matmul with f32 accumulation."""
    bb, t, h = x_ref.shape
    x2 = x_ref[...].reshape(bb * t, h)
    y = jnp.dot(x2, wT_ref[...], preferred_element_type=jnp.float32) + b_ref[...]
    return y.reshape(bb, t, h)


def _chunk_scores(pq, pk, vcol, bias, energy_dtype):
    """Additive energies + v-contraction for one source chunk.

    pq   : (Bb, T_tgt, H) f32   cached/fresh query projection
    pk   : (Bb, tile,  H) f32   projected encoder chunk
    vcol : (H, 1)
    bias : (Bb, 1, tile) f32    0 for valid source positions, -1e30 for pad/mask
    returns (Bb, T_tgt, tile) f32 masked scores (source tile = lane axis).
    """
    ed = energy_dtype
    pkT = jnp.swapaxes(pk, 1, 2).astype(ed)                              # (Bb, H, tile)
    e = jnp.tanh(pq.astype(ed)[:, :, :, None] + pkT[:, None, :, :])      # (Bb,T,H,tile)
    # Sublane (H) reduce kept in the energy dtype: avoids an f32 copy of the
    # largest tensor in the kernel (fine for moderate H; softmax math is f32).
    s = jnp.sum(e * vcol.astype(ed), axis=2)                             # (Bb,T_tgt,tile)
    # NOTE: the Linear(H, 1) bias is constant along the softmax axis -> cancels.
    return s.astype(jnp.float32) + bias


def _bahdanau_kernel_single(q_ref, enc_ref, bias_ref, whT_ref, bh_ref,
                            wsT_ref, bs_ref, vT_ref, out_ref, *, energy_dtype):
    """Whole source fits one lane-dense chunk: plain softmax, no scratch state."""
    pq = _project(q_ref, wsT_ref, bs_ref)                   # W_s s_j
    pk = _project(enc_ref, whT_ref, bh_ref)                 # W_h h_i
    scores = _chunk_scores(pq, pk, vT_ref[...], bias_ref[...], energy_dtype)
    m = jnp.max(scores, axis=-1, keepdims=True)
    p = jnp.exp(scores - m)
    l = jnp.sum(p, axis=-1, keepdims=True)
    ctx = jnp.einsum("bqs,bsh->bqh", p.astype(enc_ref.dtype), enc_ref[...],
                     preferred_element_type=jnp.float32)
    out_ref[...] = (ctx * pl.reciprocal(l, approx=False)).astype(out_ref.dtype)


def _bahdanau_kernel_multi(q_ref, enc_ref, bias_ref, whT_ref, bh_ref,
                           wsT_ref, bs_ref, vT_ref, out_ref,
                           pq_ref, m_ref, l_ref, acc_ref, *, energy_dtype):
    """Source tiled over grid axis 1: flash-style online softmax."""
    s_idx = pl.program_id(1)

    @pl.when(s_idx == 0)
    def _init():
        pq_ref[...] = _project(q_ref, wsT_ref, bs_ref)      # query projection cached
        m_ref[...] = jnp.full(m_ref.shape, _NEG_BIG, jnp.float32)
        l_ref[...] = jnp.zeros(l_ref.shape, jnp.float32)
        acc_ref[...] = jnp.zeros(acc_ref.shape, jnp.float32)

    pk = _project(enc_ref, whT_ref, bh_ref)
    scores = _chunk_scores(pq_ref[...], pk, vT_ref[...], bias_ref[...], energy_dtype)

    m_prev = m_ref[...]
    m_new = jnp.maximum(m_prev, jnp.max(scores, axis=-1, keepdims=True))
    alpha = jnp.exp(m_prev - m_new)
    p = jnp.exp(scores - m_new)                              # (Bb, T_tgt, tile)
    l_ref[...] = alpha * l_ref[...] + jnp.sum(p, axis=-1, keepdims=True)
    ctx = jnp.einsum("bqs,bsh->bqh", p.astype(enc_ref.dtype), enc_ref[...],
                     preferred_element_type=jnp.float32)
    acc_ref[...] = alpha * acc_ref[...] + ctx
    m_ref[...] = m_new

    @pl.when(s_idx == pl.num_programs(1) - 1)
    def _finalize():
        out_ref[...] = (acc_ref[...] *
                        pl.reciprocal(l_ref[...], approx=False)).astype(out_ref.dtype)


def bahdanau_attention(query, encoder_outputs, src_lengths, params, *,
                       energy_dtype=None, block_b=None, tile_src=None):
    """query: (B, T_tgt, H), encoder_outputs: (B, T_src, H), src_lengths: (B,)."""
    Wh, bh, Ws, bs, v, bv = params
    del bv   # Linear(H, 1) bias is constant over the softmax axis -> cancels exactly
    B, T_tgt, H = query.shape
    _, T_src, _ = encoder_outputs.shape
    gen = _tpu_generation()

    # bf16-native EUP/VPU on v6e/v7x halves the cost of the dominant tanh stream;
    # v5e (and unknown/interpret) stay f32 (no bf16 VALU/EUP there).
    if energy_dtype is None:
        if query.dtype == jnp.bfloat16 or (gen is not None and gen >= 6):
            energy_dtype = jnp.bfloat16
        else:
            energy_dtype = jnp.float32
    energy_itemsize = jnp.dtype(energy_dtype).itemsize
    enc_itemsize = jnp.dtype(encoder_outputs.dtype).itemsize

    # Generation-aware VMEM sizing (bigger tiles on v5e/v6e's 128 MiB, tighter
    # temporaries accounting under v7x's 64 MiB per TensorCore).
    if gen == 7:
        vmem_limit, budget = 48 * 1024 * 1024, 8 * 1024 * 1024
    elif gen in (5, 6):
        vmem_limit, budget = 96 * 1024 * 1024, 16 * 1024 * 1024
    else:
        vmem_limit, budget = 32 * 1024 * 1024, 8 * 1024 * 1024

    # Batch elements per grid step (fatter MXU matmuls, fewer ~0.35us grid steps).
    if block_b is None:
        max_bb = B
        if gen == 7 and B >= 2:
            max_bb = max(1, B // 2)   # keep >= 2 batch grid steps so both TCs get work
        cands = [d for d in range(1, max_bb + 1) if B % d == 0 and d * T_tgt <= 512]
        block_b = cands[-1] if cands else 1
        if gen == 5:                  # 4x128^2 MXU prefers 128-aligned M when possible
            aligned = [d for d in cands if (d * T_tgt) % 128 == 0]
            if aligned:
                block_b = aligned[-1]
    assert B % block_b == 0, "block_b must divide the batch size"

    # Source tile: lane-dense (multiple of 128), sized from the VMEM budget while
    # counting the energy stream + its v-product, pk, scores/p temporaries, and
    # the double-buffered encoder chunk (not just the raw energy tensor).
    if tile_src is None:
        per_col = (2 * block_b * T_tgt * H * energy_itemsize   # energies + e*v
                   + block_b * H * 4                            # pk projection (f32)
                   + 2 * block_b * H * enc_itemsize             # double-buffered enc chunk
                   + 4 * block_b * T_tgt * 4)                   # scores / p / bias
        tile_src = (budget // max(per_col, 1)) // 128 * 128
        tile_src = int(max(128, min(_round_up(T_src, 128), tile_src)))
    assert tile_src % 128 == 0, "tile_src must be a multiple of 128 (lane-dense)"

    T_padded = _round_up(T_src, tile_src)
    n_src = T_padded // tile_src
    if T_padded != T_src:   # zero-pad; padded columns are always masked below
        encoder_outputs = jnp.pad(
            encoder_outputs, ((0, 0), (0, T_padded - T_src), (0, 0)))

    # Length mask folded into an additive bias built once in the wrapper.
    # NOTE(semantics): rows with src_length == 0 yield a finite uniform attention
    # over padded keys instead of the reference's NaN from an all -inf softmax.
    col = jnp.arange(T_padded, dtype=jnp.int32)
    valid = col[None, :] < src_lengths.astype(jnp.int32)[:, None]
    score_bias = jnp.where(valid, 0.0, _NEG_BIG).astype(jnp.float32)[:, None, :]

    in_specs = [
        pl.BlockSpec((block_b, T_tgt, H), lambda b, s: (b, 0, 0)),      # query
        pl.BlockSpec((block_b, tile_src, H), lambda b, s: (b, s, 0)),   # encoder chunk
        pl.BlockSpec((block_b, 1, tile_src), lambda b, s: (b, 0, s)),   # mask bias
        pl.BlockSpec((H, H), lambda b, s: (0, 0)),                      # Wh^T
        pl.BlockSpec((1, H), lambda b, s: (0, 0)),                      # bh
        pl.BlockSpec((H, H), lambda b, s: (0, 0)),                      # Ws^T
        pl.BlockSpec((1, H), lambda b, s: (0, 0)),                      # bs
        pl.BlockSpec((H, 1), lambda b, s: (0, 0)),                      # v^T
    ]
    out_spec = pl.BlockSpec((block_b, T_tgt, H), lambda b, s: (b, 0, 0))

    if n_src == 1:
        # Single-chunk specialization: no online-softmax state, no init/finalize.
        kernel = functools.partial(_bahdanau_kernel_single, energy_dtype=energy_dtype)
        scratch = []
    else:
        kernel = functools.partial(_bahdanau_kernel_multi, energy_dtype=energy_dtype)
        scratch = [
            pltpu.VMEM((block_b, T_tgt, H), jnp.float32),   # cached W_s q projection
            pltpu.VMEM((block_b, T_tgt, 1), jnp.float32),   # running max
            pltpu.VMEM((block_b, T_tgt, 1), jnp.float32),   # running denominator
            pltpu.VMEM((block_b, T_tgt, H), jnp.float32),   # context accumulator
        ]

    grid_spec = pltpu.PrefetchScalarGridSpec(
        num_scalar_prefetch=0,
        grid=(B // block_b, n_src),
        in_specs=in_specs,
        out_specs=out_spec,
        scratch_shapes=scratch,
    )

    return pl.pallas_call(
        kernel,
        out_shape=jax.ShapeDtypeStruct((B, T_tgt, H), query.dtype),
        grid_spec=grid_spec,
        compiler_params=pltpu.CompilerParams(
            dimension_semantics=("parallel", "arbitrary"),  # batch across cores (v7x)
            vmem_limit_bytes=vmem_limit),
    )(query, encoder_outputs, score_bias,
      Wh.T, bh, Ws.T, bs, v.T)   # weight transposes hoisted out of the kernel


def _reference(query, enc, lens, Wh, bh, Ws, bs, v, bv):
    """Pure-JAX f32 reference mirroring the PyTorch forward semantics."""
    pq = query @ Ws.T + bs[0]                        # W_s s_j
    pk = enc @ Wh.T + bh[0]                          # W_h h_i
    e = jnp.tanh(pq[:, :, None, :] + pk[:, None, :, :])
    scores = jnp.sum(e * v[0], axis=-1) + bv[0, 0]   # (B, T_tgt, T_src)
    mask = jnp.arange(enc.shape[1])[None, :] < lens[:, None]
    scores = jnp.where(mask[:, None, :], scores, -jnp.inf)
    attn = jax.nn.softmax(scores, axis=-1)
    return attn @ enc


if __name__ == "__main__":
    B, T_tgt, H = 2, 8, 32

    key = jax.random.PRNGKey(0)
    k_q, k_e, k_e2, k_wh, k_bh, k_ws, k_bs, k_v, k_bv = jax.random.split(key, 9)

    scale = 1.0 / float(np.sqrt(H))
    Wh = jax.random.normal(k_wh, (H, H), jnp.float32) * scale   # nn.Linear(H, H)
    bh = jax.random.normal(k_bh, (1, H), jnp.float32) * scale
    Ws = jax.random.normal(k_ws, (H, H), jnp.float32) * scale   # nn.Linear(H, H)
    bs = jax.random.normal(k_bs, (1, H), jnp.float32) * scale
    v = jax.random.normal(k_v, (1, H), jnp.float32) * scale     # nn.Linear(H, 1)
    bv = jax.random.normal(k_bv, (1, 1), jnp.float32) * scale
    params = (Wh, bh, Ws, bs, v, bv)

    # --- test 1: small source (single lane-dense chunk), f32 energies, tight check
    T_src = 16
    query = jax.random.normal(k_q, (B, T_tgt, H), jnp.float32)
    enc = jax.random.normal(k_e, (B, T_src, H), jnp.float32)
    lens = jnp.array([T_src, 9], jnp.int32)
    ref = _reference(query, enc, lens, Wh, bh, Ws, bs, v, bv)
    out = jax.block_until_ready(
        bahdanau_attention(query, enc, lens, params, energy_dtype=jnp.float32))
    np.testing.assert_allclose(np.asarray(out), np.asarray(ref), rtol=1e-5, atol=1e-5)

    # --- test 2: longer source forcing the multi-chunk online-softmax path
    #     (second row's last chunk is fully masked)
    T_src2 = 200
    enc2 = jax.random.normal(k_e2, (B, T_src2, H), jnp.float32)
    lens2 = jnp.array([200, 100], jnp.int32)
    ref2 = _reference(query, enc2, lens2, Wh, bh, Ws, bs, v, bv)
    out2 = jax.block_until_ready(
        bahdanau_attention(query, enc2, lens2, params,
                           energy_dtype=jnp.float32, block_b=1, tile_src=128))
    np.testing.assert_allclose(np.asarray(out2), np.asarray(ref2), rtol=1e-5, atol=1e-5)

    # --- test 3: generation-aware default energy dtype (bf16 on v6e/v7x) -> loose check
    out3 = jax.block_until_ready(bahdanau_attention(query, enc, lens, params))
    np.testing.assert_allclose(np.asarray(out3), np.asarray(ref), rtol=5e-2, atol=5e-2)

    print("KERNEL_OK")
</pallas_src>

<mosaic_0001>
module attributes {stable_mosaic.version = 11 : i64} {
  func.func @_bahdanau_kernel_single(%arg0: i32, %arg1: i32, %arg2: memref<2x8x32xf32, #tpu.memory_space<vmem>>, %arg3: memref<2x128x32xf32, #tpu.memory_space<vmem>>, %arg4: memref<2x1x128xf32, #tpu.memory_space<vmem>>, %arg5: memref<32x32xf32, #tpu.memory_space<vmem>>, %arg6: memref<1x32xf32, #tpu.memory_space<vmem>>, %arg7: memref<32x32xf32, #tpu.memory_space<vmem>>, %arg8: memref<1x32xf32, #tpu.memory_space<vmem>>, %arg9: memref<32x1xf32, #tpu.memory_space<vmem>>, %arg10: memref<2x8x32xf32, #tpu.memory_space<vmem>>) attributes {dimension_semantics = [#tpu.dimension_semantics<parallel>, #tpu.dimension_semantics<arbitrary>], iteration_bounds = array<i64: 1, 1>, scalar_prefetch = 0 : i64, scratch_operands = 0 : i64, tpu.core_type = #tpu.core_type<tc>, window_params = [{transform_indices = @transform_0, window_bounds = array<i64: 2, 8, 32>}, {transform_indices = @transform_1, window_bounds = array<i64: 2, 128, 32>}, {transform_indices = @transform_2, window_bounds = array<i64: 2, 1, 128>}, {pipeline_mode = #tpu.pipeline_mode<synchronous>, transform_indices = @transform_3, window_bounds = array<i64: 32, 32>}, {pipeline_mode = #tpu.pipeline_mode<synchronous>, transform_indices = @transform_4, window_bounds = array<i64: 1, 32>}, {pipeline_mode = #tpu.pipeline_mode<synchronous>, transform_indices = @transform_5, window_bounds = array<i64: 32, 32>}, {pipeline_mode = #tpu.pipeline_mode<synchronous>, transform_indices = @transform_6, window_bounds = array<i64: 1, 32>}, {pipeline_mode = #tpu.pipeline_mode<synchronous>, transform_indices = @transform_7, window_bounds = array<i64: 32, 1>}, {transform_indices = @transform_8, window_bounds = array<i64: 2, 8, 32>}]} {
    %c0 = arith.constant 0 : index
    %c0_0 = arith.constant 0 : index
    %c0_1 = arith.constant 0 : index
    %0 = vector.load %arg2[%c0, %c0_0, %c0_1] : memref<2x8x32xf32, #tpu.memory_space<vmem>>, vector<2x8x32xf32>
    %1 = vector.shape_cast %0 : vector<2x8x32xf32> to vector<16x32xf32>
    %c0_2 = arith.constant 0 : index
    %c0_3 = arith.constant 0 : index
    %2 = vector.load %arg7[%c0_2, %c0_3] : memref<32x32xf32, #tpu.memory_space<vmem>>, vector<32x32xf32>
    %cst = arith.constant dense<0.000000e+00> : vector<16x32xf32>
    %3 = tpu.matmul %1, %2, %cst {dimension_numbers = #tpu.dot_dimension_numbers<[1], [0], [0], [1], [0, 0, 1, 1], [], []>} : vector<16x32xf32>, vector<32x32xf32>, vector<16x32xf32> -> vector<16x32xf32>
    %c0_4 = arith.constant 0 : index
    %c0_5 = arith.constant 0 : index
    %4 = vector.load %arg8[%c0_4, %c0_5] : memref<1x32xf32, #tpu.memory_space<vmem>>, vector<1x32xf32>
    %5 = vector.broadcast %4 : vector<1x32xf32> to vector<16x32xf32>
    %6 = arith.addf %3, %5 : vector<16x32xf32>
    %7 = vector.shape_cast %6 : vector<16x32xf32> to vector<2x8x32xf32>
    %c0_6 = arith.constant 0 : index
    %c0_7 = arith.constant 0 : index
    %c0_8 = arith.constant 0 : index
    %8 = vector.load %arg3[%c0_6, %c0_7, %c0_8] : memref<2x128x32xf32, #tpu.memory_space<vmem>>, vector<2x128x32xf32>
    %9 = vector.shape_cast %8 : vector<2x128x32xf32> to vector<256x32xf32>
    %c0_9 = arith.constant 0 : index
    %c0_10 = arith.constant 0 : index
    %10 = vector.load %arg5[%c0_9, %c0_10] : memref<32x32xf32, #tpu.memory_space<vmem>>, vector<32x32xf32>
    %cst_11 = arith.constant dense<0.000000e+00> : vector<256x32xf32>
    %11 = tpu.matmul %9, %10, %cst_11 {dimension_numbers = #tpu.dot_dimension_numbers<[1], [0], [0], [1], [0, 0, 1, 1], [], []>} : vector<256x32xf32>, vector<32x32xf32>, vector<256x32xf32> -> vector<256x32xf32>
    %c0_12 = arith.constant 0 : index
    %c0_13 = arith.constant 0 : index
    %12 = vector.load %arg6[%c0_12, %c0_13] : memref<1x32xf32, #tpu.memory_space<vmem>>, vector<1x32xf32>
    %13 = vector.broadcast %12 : vector<1x32xf32> to vector<256x32xf32>
    %14 = arith.addf %11, %13 : vector<256x32xf32>
    %15 = vector.shape_cast %14 : vector<256x32xf32> to vector<2x128x32xf32>
    %c0_14 = arith.constant 0 : index
    %c0_15 = arith.constant 0 : index
    %16 = vector.load %arg9[%c0_14, %c0_15] : memref<32x1xf32, #tpu.memory_space<vmem>>, vector<32x1xf32>
    %c0_16 = arith.constant 0 : index
    %c0_17 = arith.constant 0 : index
    %c0_18 = arith.constant 0 : index
    %17 = vector.load %arg4[%c0_16, %c0_17, %c0_18] : memref<2x1x128xf32, #tpu.memory_space<vmem>>, vector<2x1x128xf32>
    %18 = tpu.transpose %15, [0, 2, 1] : vector<2x128x32xf32> -> vector<2x32x128xf32>
    %19 = vector.shape_cast %7 : vector<2x8x32xf32> to vector<2x8x32x1xf32>
    %20 = vector.shape_cast %18 : vector<2x32x128xf32> to vector<2x1x32x128xf32>
    %21 = vector.broadcast %19 : vector<2x8x32x1xf32> to vector<2x8x32x128xf32>
    %22 = vector.broadcast %20 : vector<2x1x32x128xf32> to vector<2x8x32x128xf32>
    %23 = arith.addf %21, %22 : vector<2x8x32x128xf32>
    %24 = math.tanh %23 : vector<2x8x32x128xf32>
    %25 = vector.shape_cast %16 : vector<32x1xf32> to vector<1x1x32x1xf32>
    %26 = vector.broadcast %25 : vector<1x1x32x1xf32> to vector<2x8x32x128xf32>
    %27 = arith.mulf %24, %26 : vector<2x8x32x128xf32>
    %cst_19 = arith.constant dense<0.000000e+00> : vector<2x8x128xf32>
    %28 = vector.multi_reduction <add>, %27, %cst_19 [2] : vector<2x8x32x128xf32> to vector<2x8x128xf32>
    %29 = vector.broadcast %17 : vector<2x1x128xf32> to vector<2x8x128xf32>
    %30 = arith.addf %28, %29 : vector<2x8x128xf32>
    %cst_20 = arith.constant dense<0xFF800000> : vector<2x8xf32>
    %31 = vector.multi_reduction <maximumf>, %30, %cst_20 [2] : vector<2x8x128xf32> to vector<2x8xf32>
    %32 = vector.shape_cast %31 : vector<2x8xf32> to vector<2x8x1xf32>
    %33 = vector.broadcast %32 : vector<2x8x1xf32> to vector<2x8x128xf32>
    %34 = arith.subf %30, %33 : vector<2x8x128xf32>
    %35 = math.exp %34 : vector<2x8x128xf32>
    %cst_21 = arith.constant dense<0.000000e+00> : vector<2x8xf32>
    %36 = vector.multi_reduction <add>, %35, %cst_21 [2] : vector<2x8x128xf32> to vector<2x8xf32>
    %37 = vector.shape_cast %36 : vector<2x8xf32> to vector<2x8x1xf32>
    %c0_22 = arith.constant 0 : index
    %c0_23 = arith.constant 0 : index
    %c0_24 = arith.constant 0 : index
    %38 = vector.load %arg3[%c0_22, %c0_23, %c0_24] : memref<2x128x32xf32, #tpu.memory_space<vmem>>, vector<2x128x32xf32>
    "tpu.trace_start"() <{level = 10 : i32, message = "bqs,bsh->bqh"}> : () -> ()
    %cst_25 = arith.constant dense<0.000000e+00> : vector<2x8x32xf32>
    %39 = tpu.matmul %35, %38, %cst_25 {dimension_numbers = #tpu.dot_dimension_numbers<[2], [1], [1], [2], [0, 0, 0, 1, 1, 2], [0], [0]>} : vector<2x8x128xf32>, vector<2x128x32xf32>, vector<2x8x32xf32> -> vector<2x8x32xf32>
    "tpu.trace_stop"() : () -> ()
    %40 = tpu.reciprocal %37 : vector<2x8x1xf32> -> vector<2x8x1xf32>
    %41 = vector.broadcast %40 : vector<2x8x1xf32> to vector<2x8x32xf32>
    %42 = arith.mulf %39, %41 : vector<2x8x32xf32>
    %c0_26 = arith.constant 0 : index
    %c0_27 = arith.constant 0 : index
    %c0_28 = arith.constant 0 : index
    %43 = vector.load %arg10[%c0_26, %c0_27, %c0_28] : memref<2x8x32xf32, #tpu.memory_space<vmem>>, vector<2x8x32xf32>
    tpu.vector_store %arg10[%c0_26, %c0_27, %c0_28], %42 {strides = array<i32>} : memref<2x8x32xf32, #tpu.memory_space<vmem>>, vector<2x8x32xf32>,
    return
  }
  func.func @transform_0(%arg0: i32, %arg1: i32) -> (i32, i32, i32) {
    %c0_i32 = arith.constant 0 : i32
    %c0_i32_0 = arith.constant 0 : i32
    %c0_i32_1 = arith.constant 0 : i32
    return %arg0, %c0_i32, %c0_i32_0 : i32, i32, i32
  }
  func.func @transform_1(%arg0: i32, %arg1: i32) -> (i32, i32, i32) {
    %c0_i32 = arith.constant 0 : i32
    %c0_i32_0 = arith.constant 0 : i32
    return %arg0, %arg1, %c0_i32 : i32, i32, i32
  }
  func.func @transform_2(%arg0: i32, %arg1: i32) -> (i32, i32, i32) {
    %c0_i32 = arith.constant 0 : i32
    %c0_i32_0 = arith.constant 0 : i32
    return %arg0, %c0_i32, %arg1 : i32, i32, i32
  }
  func.func @transform_3(%arg0: i32, %arg1: i32) -> (i32, i32) {
    %c0_i32 = arith.constant 0 : i32
    %c0_i32_0 = arith.constant 0 : i32
    %c0_i32_1 = arith.constant 0 : i32
    return %c0_i32, %c0_i32_0 : i32, i32
  }
  func.func @transform_4(%arg0: i32, %arg1: i32) -> (i32, i32) {
    %c0_i32 = arith.constant 0 : i32
    %c0_i32_0 = arith.constant 0 : i32
    %c0_i32_1 = arith.constant 0 : i32
    return %c0_i32, %c0_i32_0 : i32, i32
  }
  func.func @transform_5(%arg0: i32, %arg1: i32) -> (i32, i32) {
    %c0_i32 = arith.constant 0 : i32
    %c0_i32_0 = arith.constant 0 : i32
    %c0_i32_1 = arith.constant 0 : i32
    return %c0_i32, %c0_i32_0 : i32, i32
  }
  func.func @transform_6(%arg0: i32, %arg1: i32) -> (i32, i32) {
    %c0_i32 = arith.constant 0 : i32
    %c0_i32_0 = arith.constant 0 : i32
    %c0_i32_1 = arith.constant 0 : i32
    return %c0_i32, %c0_i32_0 : i32, i32
  }
  func.func @transform_7(%arg0: i32, %arg1: i32) -> (i32, i32) {
    %c0_i32 = arith.constant 0 : i32
    %c0_i32_0 = arith.constant 0 : i32
    %c0_i32_1 = arith.constant 0 : i32
    return %c0_i32, %c0_i32_0 : i32, i32
  }
  func.func @transform_8(%arg0: i32, %arg1: i32) -> (i32, i32, i32) {
    %c0_i32 = arith.constant 0 : i32
    %c0_i32_0 = arith.constant 0 : i32
    %c0_i32_1 = arith.constant 0 : i32
    return %arg0, %c0_i32, %c0_i32_0 : i32, i32, i32
  }
}

</mosaic_0001>

<bundles_post_ra>
// kernel: tpu_custom_call.1
= control target key start
LH: loop header
LB: loop body
LE: loop exit
PB: predicated region body
PF: predicated region fallthrough
CT: control target
= control target key end

     0   :  { %vm43_vm0 = vcmask 261120   ;;  %v2065_v3 = vmov 0   ;;  %s2910_s0 = inlined_call_operand.vmem [shape: f32[2,8,32], index: 0, kind: input, shape index: {}]   ;;  %s2911_s1 = inlined_call_operand.vmem [shape: f32[2,128,32], index: 1, kind: input, shape index: {}]   ;;  %s2912_s2 = inlined_call_operand.vmem [shape: f32[2,1,128], index: 2, kind: input, shape index: {}]   ;;  %s2913_s3 = inlined_call_operand.vmem [shape: f32[32,32], index: 3, kind: input, shape index: {}]   ;;  %s2914_s4 = inlined_call_operand.vmem [shape: f32[1,32], index: 4, kind: input, shape index: {}]   ;;  %s2915_s5 = inlined_call_operand.vmem [shape: f32[32,32], index: 5, kind: input, shape index: {}]   ;;  %s2916_s6 = inlined_call_operand.vmem [shape: f32[1,32], index: 6, kind: input, shape index: {}]   ;;  %s2917_s7 = inlined_call_operand.vmem [shape: f32[32,1], index: 7, kind: input, shape index: {}]   ;;  %s2918_s8 = inlined_call_operand.hbm [shape: f32[2,8,32], index: 8, kind: output, shape index: {}]  }
   0x1   :  { %v35_v0 = vld [vmem:[%s2915_s5 + $0x18] sm:$0xff]  ;;  %v34_v1 = vld [vmem:[%s2915_s5 + $0x10] sm:$0xff]  ;;  %v30_v2 = vld [vmem:[%s2910_s0] sm:$0xff]  ;;  %1853 = vset.pattern.permute.xlu0 %v2065_v3 }
   0x2   :  { %1710 = vmatprep.subr.mxu0 %v35_v0  ;;  %v33_v4 = vld [vmem:[%s2915_s5 + $0x8] sm:$0xff]  ;;  %1718 = vmatprep.mubr.msk.f32.mxu0 %vm43_vm0, %v30_v2  ;;  %v160_v5 = vld [vmem:[%s2913_s3 + $0x18] sm:$0xff]  ;;  %v159_v6 = vld [vmem:[%s2913_s3 + $0x10] sm:$0xff] }
   0x3   :  { %1711 = vmatpush3.msra.mxu0 %v35_v0  ;;  %1721 = vmatprep.subr.mxu1 %v160_v5  ;;  %v32_v7 = vld [vmem:[%s2915_s5] sm:$0xff]  ;;  %v158_v8 = vld [vmem:[%s2913_s3 + $0x8] sm:$0xff]  ;;  %v127_v14 = vld [vmem:[%s2911_s1 + $0x10] sm:$0xff] }
   0x4   :  { %1712 = vmatprep.subr.mxu0 %v34_v1  ;;  %1722 = vmatpush3.msra.mxu1 %v160_v5  ;;  %v31_v9 = vld [vmem:[%s2910_s0 + $0x8] sm:$0xff]  ;;  %v157_v10 = vld [vmem:[%s2913_s3] sm:$0xff] }
   0x5   :  { %1713 = vmatpush3.msra.mxu0 %v34_v1  ;;  %1723 = vmatprep.subr.mxu1 %v159_v6  ;;  %v125_v11 = vld [vmem:[%s2911_s1] sm:$0xff]  ;;  %v126_v12 = vld [vmem:[%s2911_s1 + $0x8] sm:$0xff] }
   0x6   :  { %1714 = vmatprep.subr.mxu0 %v33_v4  ;;  %1724 = vmatpush3.msra.mxu1 %v159_v6  ;;  %v489_v13 = vld [vmem:[%s2917_s7] sm:$0xff]  ;;  %v490_v15 = vld [vmem:[%s2917_s7 + $0x8] sm:$0xff] }
   0x7   :  { %1715 = vmatpush3.msra.mxu0 %v33_v4  ;;  %1725 = vmatprep.subr.mxu1 %v158_v8 }
   0x8   :  { %1716 = vmatprep.subr.mxu0 %v32_v7  ;;  %1726 = vmatpush3.msra.mxu1 %v158_v8 }
   0x9   :  { %1717 = vmatpush3.msra.mxu0 %v32_v7  ;;  %1727 = vmatprep.subr.mxu1 %v157_v10 }
   0xa   :  { %1719 = vmatmul.mubr.msk.f32.vlgmr.msra.gmra.mxu0 %vm43_vm0, %v31_v9  ;;  %1728 = vmatpush3.msra.mxu1 %v157_v10 }
   0xb   :  { %1729 = vmatprep.mubr.msk.f32.mxu1 %vm43_vm0, %v125_v11 }
   0xc   :  { %13 = vsyncpa [#allocation3], 0  ;;  %1730 = vmatmul.mubr.msk.f32.vlgmr.msra.gmra.mxu1 %vm43_vm0, %v126_v12  ;;  %993 = vperm.xlu0 %1853, %v489_v13   ;;  %v128_v16 = vld [vmem:[%s2911_s1 + $0x18] sm:$0xff]  ;;  %v129_v18 = vld [vmem:[%s2911_s1 + $0x20] sm:$0xff]  ;;  %v559_v47 = vlaneseq  ;;  %vm1264_vm1 = vcmask 1041409   ;;  %vm1267_vm2 = vcmask 1042434  }
   0xd   :  { %1732 = vmatprep.mubr.msk.f32.mxu1 %vm43_vm0, %v127_v14  ;;  %1854 = vset.pattern.permute.xlu1 %v2065_v3  ;;  %v492_v17 = vld [vmem:[%s2917_s7 + $0x18] sm:$0xff]  ;;  %v491_v19 = vld [vmem:[%s2917_s7 + $0x10] sm:$0xff]  ;;  %v130_v20 = vld [vmem:[%s2911_s1 + $0x28] sm:$0xff]  ;;  %vm1270_vm3 = vcmask 1043459   ;;  %vm1273_vm4 = vcmask 1044484   ;;  %vm1276_vm5 = vcmask 1045509  }
   0xe   :  { %998 = vperm.xlu1 %1854, %v490_v15   ;;  %v131_v21 = vld [vmem:[%s2911_s1 + $0x30] sm:$0xff]  ;;  %v132_v22 = vld [vmem:[%s2911_s1 + $0x38] sm:$0xff]  ;;  %v2194_v23 = vld [vmem:[%s2911_s1 + $0x40] sm:$0xff]  ;;  %v2312_v48 = vshrl.u32 %v559_v47, 7  ;;  %vm1279_vm6 = vcmask 1046534   ;;  %vm1282_vm7 = vcmask 1047559  }
   0xf   :  { %v2202_v24 = vld [vmem:[%s2911_s1 + $0x48] sm:$0xff]  ;;  %v2207_v25 = vld [vmem:[%s2911_s1 + $0x50] sm:$0xff]  ;;  %v2216_v26 = vld [vmem:[%s2911_s1 + $0x58] sm:$0xff]  ;;  %vm2067_vm8 = vmmov 0  }
  0x10   :  { %1733 = vmatmul.mubr.msk.f32.gmra.mxu1 %vm43_vm0, %v128_v16  ;;  %1008 = vperm.xlu0 %1853, %v492_v17   ;;  %v2221_v27 = vld [vmem:[%s2911_s1 + $0x60] sm:$0xff]  ;;  %v2230_v28 = vld [vmem:[%s2911_s1 + $0x68] sm:$0xff]  ;;  %v2235_v29 = vld [vmem:[%s2911_s1 + $0x70] sm:$0xff]  ;;  %v580_v50 = vsub.s32 1, %v2312_v48  ;;  %v599_v56 = vsub.s32 2, %v2312_v48  ;;  %v561_v59 = vsub.s32 0, %v2312_v48 }
  0x11   :  { %1735 = vmatprep.mubr.msk.f32.mxu1 %vm43_vm0, %v129_v18  ;;  %v2244_v30 = vld [vmem:[%s2911_s1 + $0x78] sm:$0xff]  ;;  %v141_v31 = vld [vmem:[%s2911_s1 + $0x80] sm:$0xff]  ;;  %v142_v32 = vld [vmem:[%s2911_s1 + $0x88] sm:$0xff]  ;;  %v618_v61 = vsub.s32 3, %v2312_v48  ;;  %v637_v0 = vsub.s32 4, %v2312_v48  ;;  %v656_v4 = vsub.s32 5, %v2312_v48 }
  0x12   :  { %1003 = vperm.xlu1 %1854, %v491_v19   ;;  %v143_v33 = vld [vmem:[%s2911_s1 + $0x90] sm:$0xff]  ;;  %v144_v34 = vld [vmem:[%s2911_s1 + $0x98] sm:$0xff]  ;;  %v145_v35 = vld [vmem:[%s2911_s1 + $0xa0] sm:$0xff]  ;;  %v675_v6 = vsub.s32 6, %v2312_v48  ;;  %v694_v9 = vsub.s32 7, %v2312_v48 }
  0x13   :  { %v146_v36 = vld [vmem:[%s2911_s1 + $0xa8] sm:$0xff]  ;;  %v147_v37 = vld [vmem:[%s2911_s1 + $0xb0] sm:$0xff]  ;;  %v148_v38 = vld [vmem:[%s2911_s1 + $0xb8] sm:$0xff] }
  0x14   :  { %1736 = vmatmul.mubr.msk.f32.gmra.mxu1 %vm43_vm0, %v130_v20  ;;  %v149_v39 = vld [vmem:[%s2911_s1 + $0xc0] sm:$0xff]  ;;  %v150_v40 = vld [vmem:[%s2911_s1 + $0xc8] sm:$0xff]  ;;  %v151_v41 = vld [vmem:[%s2911_s1 + $0xd0] sm:$0xff] }
  0x15   :  { %1738 = vmatprep.mubr.msk.f32.mxu1 %vm43_vm0, %v131_v21  ;;  %v152_v42 = vld [vmem:[%s2911_s1 + $0xd8] sm:$0xff]  ;;  %v153_v43 = vld [vmem:[%s2911_s1 + $0xe0] sm:$0xff]  ;;  %v154_v44 = vld [vmem:[%s2911_s1 + $0xe8] sm:$0xff] }
  0x16   :  { %v155_v45 = vld [vmem:[%s2911_s1 + $0xf0] sm:$0xff]  ;;  %v156_v46 = vld [vmem:[%s2911_s1 + $0xf8] sm:$0xff]  ;;  %v1596_v49 = vld [vmem:[%s2916_s6] ss:$0 sm:$0xff] }
  0x17   :  { %v2378_v15 = vld [vmem:[%s2914_s4] ss:$0 sm:$0xff] }
  0x18   :  { %1739 = vmatmul.mubr.msk.f32.gmra.mxu1 %vm43_vm0, %v132_v22 }
  0x19   :  { %1741 = vmatprep.mubr.msk.f32.mxu1 %vm43_vm0, %v2194_v23 }
  0x1c   :  { %1742 = vmatmul.mubr.msk.f32.gmra.mxu1 %vm43_vm0, %v2202_v24 }
  0x1d   :  { %1744 = vmatprep.mubr.msk.f32.mxu1 %vm43_vm0, %v2207_v25 }
  0x20   :  { %1745 = vmatmul.mubr.msk.f32.gmra.mxu1 %vm43_vm0, %v2216_v26 }
  0x21   :  { %1747 = vmatprep.mubr.msk.f32.mxu1 %vm43_vm0, %v2221_v27 }
  0x24   :  { %1748 = vmatmul.mubr.msk.f32.gmra.mxu1 %vm43_vm0, %v2230_v28 }
  0x25   :  { %1750 = vmatprep.mubr.msk.f32.mxu1 %vm43_vm0, %v2235_v29 }
  0x28   :  { %1751 = vmatmul.mubr.msk.f32.gmra.mxu1 %vm43_vm0, %v2244_v30 }
  0x29   :  { %1753 = vmatprep.mubr.msk.f32.mxu1 %vm43_vm0, %v141_v31 }
  0x2c   :  { %1754 = vmatmul.mubr.msk.f32.gmra.mxu1 %vm43_vm0, %v142_v32 }
  0x2d   :  { %1756 = vmatprep.mubr.msk.f32.mxu1 %vm43_vm0, %v143_v33 }
  0x30   :  { %1757 = vmatmul.mubr.msk.f32.gmra.mxu1 %vm43_vm0, %v144_v34 }
  0x31   :  { %1759 = vmatprep.mubr.msk.f32.mxu1 %vm43_vm0, %v145_v35 }
  0x34   :  { %1760 = vmatmul.mubr.msk.f32.gmra.mxu1 %vm43_vm0, %v146_v36 }
  0x35   :  { %1762 = vmatprep.mubr.msk.f32.mxu1 %vm43_vm0, %v147_v37 }
  0x38   :  { %1763 = vmatmul.mubr.msk.f32.gmra.mxu1 %vm43_vm0, %v148_v38 }
  0x39   :  { %1765 = vmatprep.mubr.msk.f32.mxu1 %vm43_vm0, %v149_v39 }
  0x3c   :  { %1766 = vmatmul.mubr.msk.f32.gmra.mxu1 %vm43_vm0, %v150_v40 }
  0x3d   :  { %1768 = vmatprep.mubr.msk.f32.mxu1 %vm43_vm0, %v151_v41 }
  0x40   :  { %1769 = vmatmul.mubr.msk.f32.gmra.mxu1 %vm43_vm0, %v152_v42 }
  0x41   :  { %1771 = vmatprep.mubr.msk.f32.mxu1 %vm43_vm0, %v153_v43 }
  0x44   :  { %1772 = vmatmul.mubr.msk.f32.gmra.mxu1 %vm43_vm0, %v154_v44 }
  0x45   :  { %1774 = vmatprep.mubr.msk.f32.mxu1 %vm43_vm0, %v155_v45 }
  0x48   :  { %1775 = vmatmul.mubr.msk.f32.gmra.mxu1 %vm43_vm0, %v156_v46 }
  0x87   :  { %v2381_v19 = vpop.permute.xlu0 %993 }
  0x89   :  { %v2397_v41 = vpop.permute.xlu1 %998 }
  0x8b   :  { %v2386_v31 = vpop.permute.xlu0 %1008 }
  0x8d   :  { %v2405_v46 = vpop.permute.xlu1 %1003 }
  0xca   :  { %v1720_v51 = vpop.f32.mrf.mxu0 }
  0xcb   :  { %v2318_v52 = vadd.f32 %v1720_v51, %v1596_v49 }
  0xcc   :  { %v116_v53 = vpop.f32.mrf.mxu0  ;;  %v1731_v13 = vpop.f32.mrf.mxu1 }
  0xcd   :  { %v117_v54 = vadd.f32 %v1596_v49, %v116_v53  ;;  %v733_v55 = vrot.slane %v2318_v52, %v580_v50  ;;  %v752_v58 = vrot.slane %v2318_v52, %v599_v56  ;;  %v714_v63 = vrot.slane %v2318_v52, %v561_v59 }
  0xce   :  { %v771_v3 = vrot.slane %v2318_v52, %v618_v61  ;;  %v2346_v8 = vrot.slane %v2318_v52, %v637_v0  ;;  %v2359_v11 = vrot.slane %v2318_v52, %v656_v4  ;;  %v2366_v12 = vrot.slane %v2318_v52, %v675_v6  ;;  %v330_v16 = vpop.f32.mrf.mxu1 }
  0xcf   :  { %735 = vbcast.lane.b32.xlu0 %v733_v55, 256  ;;  %v600_v57 = vrot.slane %v117_v54, %v599_v56  ;;  %v2324_v60 = vrot.slane %v117_v54, %v561_v59  ;;  %v2328_v62 = vrot.slane %v117_v54, %v618_v61  ;;  %v2333_v1 = vrot.slane %v117_v54, %v637_v0 }
  0xd0   :  { %v581_v2 = vrot.slane %v117_v54, %v580_v50  ;;  %v2338_v5 = vrot.slane %v117_v54, %v656_v4  ;;  %v2342_v7 = vrot.slane %v117_v54, %v675_v6  ;;  %v2353_v10 = vrot.slane %v117_v54, %v694_v9  ;;  %v1734_v18 = vpop.f32.mrf.mxu1 }
  0xd1   :  { %602 = vbcast.lane.b32.xlu1 %v600_v57, 256  ;;  %v2372_v14 = vrot.slane %v2318_v52, %v694_v9  ;;  %v331_v17 = vadd.f32 %v2378_v15, %v330_v16  ;;  %v336_v20 = vadd.f32 %v1731_v13, %v2378_v15  ;;  %v346_v33 = vadd.f32 %v1734_v18, %v2378_v15 }
  0xd2   :  { %v340_v21 = vpop.f32.mrf.mxu1 }
  0xd3   :  { %739 = vbcast.lane.b32.xlu0 %v733_v55, 264  ;;  %v341_v22 = vadd.f32 %v2378_v15, %v340_v21 }
  0xd4   :  { %v1737_v32 = vpop.f32.mrf.mxu1 }
  0xd5   :  { %606 = vbcast.lane.b32.xlu1 %v600_v57, 264  ;;  %v356_v39 = vadd.f32 %v1737_v32, %v2378_v15 }
  0xd6   :  { %v350_v34 = vpop.f32.mrf.mxu1 }
  0xd7   :  { %754 = vbcast.lane.b32.xlu0 %v752_v58, 256  ;;  %v351_v36 = vadd.f32 %v2378_v15, %v350_v34 }
  0xd8   :  { %v1740_v37 = vpop.f32.mrf.mxu1 }
  0xd9   :  { %568 = vbcast.lane.b32.xlu1 %v2324_v60, 264  ;;  %v366_v47 = vadd.f32 %v1740_v37, %v2378_v15 }
  0xda   :  { %v360_v40 = vpop.f32.mrf.mxu1 }
  0xdb   :  { %758 = vbcast.lane.b32.xlu0 %v752_v58, 264  ;;  %v361_v43 = vadd.f32 %v2378_v15, %v360_v40 }
  0xdc   :  { %v1743_v44 = vpop.f32.mrf.mxu1 }
  0xdd   :  { %621 = vbcast.lane.b32.xlu1 %v2328_v62, 256  ;;  %v376_v54 = vadd.f32 %v1743_v44, %v2378_v15 }
  0xde   :  { %v370_v48 = vpop.f32.mrf.mxu1 }
  0xdf   :  { %716 = vbcast.lane.b32.xlu0 %v714_v63, 256  ;;  %v371_v50 = vadd.f32 %v2378_v15, %v370_v48 }
  0xe0   :  { %v1746_v51 = vpop.f32.mrf.mxu1 }
  0xe1   :  { %610 = vbcast.lane.b32.xlu1 %v600_v57, 272  ;;  %v386_v61 = vadd.f32 %v1746_v51, %v2378_v15 }
  0xe3   :  { %720 = vbcast.lane.b32.xlu0 %v714_v63, 264 }
  0xe5   :  { %644 = vbcast.lane.b32.xlu1 %v2333_v1, 264 }
  0xe7   :  { %743 = vbcast.lane.b32.xlu0 %v733_v55, 272 }
  0xe9   :  { %595 = vbcast.lane.b32.xlu1 %v581_v2, 280 }
  0xeb   :  { %773 = vbcast.lane.b32.xlu0 %v771_v3, 256 }
  0xed   :  { %659 = vbcast.lane.b32.xlu1 %v2338_v5, 256 }
  0xef   :  { %777 = vbcast.lane.b32.xlu0 %v771_v3, 264 }
  0xf1   :  { %614 = vbcast.lane.b32.xlu1 %v600_v57, 280 }
  0xf3   :  { %762 = vbcast.lane.b32.xlu0 %v752_v58, 272 }
  0xf5   :  { %678 = vbcast.lane.b32.xlu1 %v2342_v7, 256 }
  0xf7   :  { %792 = vbcast.lane.b32.xlu0 %v2346_v8, 256 }
  0xf9   :  { %576 = vbcast.lane.b32.xlu1 %v2324_v60, 280 }
  0xfb   :  { %796 = vbcast.lane.b32.xlu0 %v2346_v8, 264 }
  0xfd   :  { %667 = vbcast.lane.b32.xlu1 %v2338_v5, 272 }
  0xff   :  { %724 = vbcast.lane.b32.xlu0 %v714_v63, 272 }
 0x101   :  { %701 = vbcast.lane.b32.xlu1 %v2353_v10, 264 }
 0x103   :  { %747 = vbcast.lane.b32.xlu0 %v733_v55, 280  ;;  %v380_v55 = vpop.f32.mrf.mxu1 }
 0x105   :  { %686 = vbcast.lane.b32.xlu1 %v2342_v7, 272  ;;  %v1749_v59 = vpop.f32.mrf.mxu1 }
 0x106   :  { %v396_v13 = vadd.f32 %v1749_v59, %v2378_v15 }
 0x107   :  { %781 = vbcast.lane.b32.xlu0 %v771_v3, 272 }
 0x109   :  { %705 = vbcast.lane.b32.xlu1 %v2353_v10, 272 }
 0x10b   :  { %811 = vbcast.lane.b32.xlu0 %v2359_v11, 256 }
 0x10d   :  { %709 = vbcast.lane.b32.xlu1 %v2353_v10, 280 }
 0x10f   :  { %815 = vbcast.lane.b32.xlu0 %v2359_v11, 264 }
 0x113   :  { %766 = vbcast.lane.b32.xlu0 %v752_v58, 280  ;;  %v381_v58 = vadd.f32 %v2378_v15, %v380_v55 }
 0x117   :  { %800 = vbcast.lane.b32.xlu0 %v2346_v8, 272 }
 0x11b   :  { %830 = vbcast.lane.b32.xlu0 %v2366_v12, 256 }
 0x11f   :  { %834 = vbcast.lane.b32.xlu0 %v2366_v12, 264 }
 0x123   :  { %728 = vbcast.lane.b32.xlu0 %v714_v63, 280  ;;  %v390_v63 = vpop.f32.mrf.mxu1 }
 0x125   :  { %v1752_v4 = vpop.f32.mrf.mxu1 }
 0x127   :  { %785 = vbcast.lane.b32.xlu0 %v771_v3, 280  ;;  %v391_v3 = vadd.f32 %v2378_v15, %v390_v63 }
 0x12b   :  { %819 = vbcast.lane.b32.xlu0 %v2359_v11, 272 }
 0x12f   :  { %849 = vbcast.lane.b32.xlu0 %v2372_v14, 256 }
 0x133   :  { %583 = vbcast.lane.b32.xlu0 %v581_v2, 256 }
 0x136   :  { %495 = vxpose.xlu1.b32.start [1/16] (narrow) %v331_v17, 32 }
 0x137   :  { %587 = vbcast.lane.b32.xlu0 %v581_v2, 264 }
 0x13a   :  { %496 = vxpose.xlu1.b32.cont [2/16] (narrow) %v336_v20, 32  ;;  %v406_v20 = vadd.f32 %v1752_v4, %v2378_v15 }
 0x13b   :  { %564 = vbcast.lane.b32.xlu0 %v2324_v60, 256 }
 0x13e   :  { %497 = vxpose.xlu1.b32.cont [3/16] (narrow) %v341_v22, 32 }
 0x13f   :  { %591 = vbcast.lane.b32.xlu0 %v581_v2, 272 }
 0x141   :  { %v2389_v35 = vpop.permute.xlu0 %735 }
 0x142   :  { %498 = vxpose.xlu1.b32.cont [4/16] (narrow) %v346_v33, 32 }
 0x143   :  { %625 = vbcast.lane.b32.xlu0 %v2328_v62, 264  ;;  %v2413_v52 = vpop.permute.xlu1 %602 }
 0x145   :  { %v2393_v38 = vpop.permute.xlu0 %739 }
 0x146   :  { %499 = vxpose.xlu1.b32.cont [5/16] (narrow) %v351_v36, 32 }
 0x147   :  { %640 = vbcast.lane.b32.xlu0 %v2333_v1, 256  ;;  %v2421_v57 = vpop.permute.xlu1 %606 }
 0x149   :  { %v2399_v42 = vpop.permute.xlu0 %754 }
 0x14a   :  { %500 = vxpose.xlu1.b32.cont [6/16] (narrow) %v356_v39, 32 }
 0x14b   :  { %572 = vbcast.lane.b32.xlu0 %v2324_v60, 272  ;;  %v2429_v0 = vpop.permute.xlu1 %568 }
 0x14d   :  { %v2403_v45 = vpop.permute.xlu0 %758 }
 0x14e   :  { %501 = vxpose.xlu1.b32.cont [7/16] (narrow) %v361_v43, 32 }
 0x14f   :  { %629 = vbcast.lane.b32.xlu0 %v2328_v62, 272  ;;  %v2437_v9 = vpop.permute.xlu1 %621 }
 0x151   :  { %v2409_v49 = vpop.permute.xlu0 %716 }
 0x152   :  { %502 = vxpose.xlu1.b32.cont [8/16] (narrow) %v366_v47, 32 }
 0x153   :  { %663 = vbcast.lane.b32.xlu0 %v2338_v5, 264  ;;  %v2445_v18 = vpop.permute.xlu1 %610 }
 0x155   :  { %v2415_v53 = vpop.permute.xlu0 %720 }
 0x156   :  { %503 = vxpose.xlu1.b32.cont [9/16] (narrow) %v371_v50, 32 }
 0x157   :  { %648 = vbcast.lane.b32.xlu0 %v2333_v1, 272 }
 0x159   :  { %v2419_v56 = vpop.permute.xlu0 %743 }
 0x15a   :  { %2919 = vst [vmem:[#allocation5_spill] sm:$0xff] %v2419_v56  ;;  %504 = vxpose.xlu1.b32.cont [10/16] (narrow) %v376_v54, 32 }
 0x15b   :  { %682 = vbcast.lane.b32.xlu0 %v2342_v7, 264 }
 0x15d   :  { %v2425_v60 = vpop.permute.xlu0 %773 }
 0x15e   :  { %505 = vxpose.xlu1.b32.cont [11/16] (narrow) %v381_v58, 32 }
 0x15f   :  { %633 = vbcast.lane.b32.xlu0 %v2328_v62, 280  ;;  %v400_v62 = vpop.f32.mrf.mxu1 }
 0x160   :  { %v401_v17 = vadd.f32 %v2378_v15, %v400_v62 }
 0x161   :  { %v2431_v2 = vpop.permute.xlu0 %777  ;;  %v1755_v50 = vpop.f32.mrf.mxu1 }
 0x162   :  { %506 = vxpose.xlu1.b32.cont [12/16] (narrow) %v386_v61, 32  ;;  %v416_v63 = vadd.f32 %v1755_v50, %v2378_v15 }
 0x163   :  { %697 = vbcast.lane.b32.xlu0 %v2353_v10, 256  ;;  %v410_v54 = vpop.f32.mrf.mxu1 }
 0x165   :  { %v2435_v6 = vpop.permute.xlu0 %762  ;;  %v1758_v59 = vpop.f32.mrf.mxu1 }
 0x166   :  { %2920 = vst [vmem:[#allocation6_spill] sm:$0xff] %v2435_v6  ;;  %507 = vxpose.xlu1.b32.cont [13/16] (narrow) %v391_v3, 32 }
 0x167   :  { %652 = vbcast.lane.b32.xlu0 %v2333_v1, 280  ;;  %v2453_v1 = vpop.permute.xlu1 %644  ;;  %v420_v4 = vpop.f32.mrf.mxu1 }
 0x168   :  { %v421_v62 = vadd.f32 %v2378_v15, %v420_v4 }
 0x169   :  { %v2441_v16 = vpop.permute.xlu0 %792 }
 0x16a   :  { %508 = vxpose.xlu1.b32.cont [14/16] (narrow) %v396_v13, 32 }
 0x16b   :  { %671 = vbcast.lane.b32.xlu0 %v2338_v5, 280  ;;  %v2459_v5 = vpop.permute.xlu1 %595 }
 0x16d   :  { %v2447_v10 = vpop.permute.xlu0 %796 }
 0x16e   :  { %509 = vxpose.xlu1.b32.cont [15/16] (narrow) %v401_v17, 32  ;;  %v1761_v17 = vpop.f32.mrf.mxu1 }
 0x16f   :  { %690 = vbcast.lane.b32.xlu0 %v2342_v7, 280  ;;  %v2466_v7 = vpop.permute.xlu1 %659  ;;  %v436_v4 = vadd.f32 %v1761_v17, %v2378_v15 }
 0x171   :  { %v2451_v21 = vpop.permute.xlu0 %724 }
 0x172   :  { %2921 = vst [vmem:[#allocation7_spill] sm:$0xff] %v2451_v21  ;;  %510 = vxpose.xlu1.b32.end [16/16] (narrow) %v406_v20, 32 }
 0x173   :  { %804 = vbcast.lane.b32.xlu0 %v2346_v8, 280  ;;  %v2472_v8 = vpop.permute.xlu1 %614 }
 0x175   :  { %v2456_v22 = vpop.permute.xlu0 %747 }
 0x176   :  { %2922 = vst [vmem:[#allocation8_spill] sm:$0xff] %v2456_v22 }
 0x177   :  { %838 = vbcast.lane.b32.xlu0 %v2366_v12, 272  ;;  %v2479_v39 = vpop.permute.xlu1 %678 }
 0x179   :  { %v2461_v32 = vpop.permute.xlu0 %781 }
 0x17a   :  { %2923 = vst [vmem:[#allocation9_spill] sm:$0xff] %v2461_v32 }
 0x17b   :  { %823 = vbcast.lane.b32.xlu0 %v2359_v11, 280  ;;  %v2483_v40 = vpop.permute.xlu1 %576 }
 0x17d   :  { %v2464_v33 = vpop.permute.xlu0 %811 }
 0x17f   :  { %857 = vbcast.lane.b32.xlu0 %v2372_v14, 272 }
 0x181   :  { %v2469_v34 = vpop.permute.xlu0 %815 }
 0x183   :  { %842 = vbcast.lane.b32.xlu0 %v2366_v12, 280  ;;  %v2490_v12 = vpop.permute.xlu1 %667 }
 0x185   :  { %v2474_v36 = vpop.permute.xlu0 %766 }
 0x186   :  { %2924 = vst [vmem:[#allocation10_spill] sm:$0xff] %v2474_v36  ;;  %v426_v36 = vadd.f32 %v1758_v59, %v2378_v15 }
 0x187   :  { %861 = vbcast.lane.b32.xlu0 %v2372_v14, 280  ;;  %v2494_v48 = vpop.permute.xlu1 %701 }
 0x189   :  { %v2477_v37 = vpop.permute.xlu0 %800 }
 0x18a   :  { %2925 = vst [vmem:[#allocation11_spill] sm:$0xff] %v2477_v37 }
 0x18b   :  { %v2500_v58 = vpop.permute.xlu1 %686 }
 0x18d   :  { %v2481_v11 = vpop.permute.xlu0 %830 }
 0x18f   :  { %v2504_v3 = vpop.permute.xlu1 %705 }
 0x190   :  { %853 = vbcast.lane.b32.xlu1 %v2372_v14, 264  ;;  %v411_v14 = vadd.f32 %v2378_v15, %v410_v54  ;;  %v430_v54 = vpop.f32.mrf.mxu1 }
 0x191   :  { %v2486_v43 = vpop.permute.xlu0 %834  ;;  %v431_v50 = vadd.f32 %v2378_v15, %v430_v54 }
 0x195   :  { %v2488_v44 = vpop.permute.xlu0 %728 }
 0x196   :  { %2926 = vst [vmem:[#allocation12_spill] sm:$0xff] %v2488_v44  ;;  %v1764_v44 = vpop.f32.mrf.mxu1 }
 0x199   :  { %v2492_v47 = vpop.permute.xlu0 %785 }
 0x19a   :  { %2927 = vst [vmem:[#allocation13_spill] sm:$0xff] %v2492_v47  ;;  %v2507_v47 = vpop.permute.xlu1 %709 }
 0x19d   :  { %v2496_v51 = vpop.permute.xlu0 %819 }
 0x19e   :  { %2928 = vst [vmem:[#allocation14_spill] sm:$0xff] %v2496_v51 }
 0x1a1   :  { %v2498_v55 = vpop.permute.xlu0 %849 }
 0x1a5   :  { %v584_v61 = vpop.permute.xlu0 %583  ;;  %527 = vxpose.xlu0.b32.start [1/16] (narrow) %v411_v14, 32 }
 0x1a9   :  { %v588_v13 = vpop.permute.xlu0 %587  ;;  %528 = vxpose.xlu0.b32.cont [2/16] (narrow) %v416_v63, 32 }
 0x1ad   :  { %529 = vxpose.xlu0.b32.cont [3/16] (narrow) %v421_v62, 32  ;;  %v565_v20 = vpop.permute.xlu0 %564  ;;  %v440_v62 = vpop.f32.mrf.mxu1 }
 0x1b1   :  { %530 = vxpose.xlu0.b32.cont [4/16] (narrow) %v426_v36, 32  ;;  %v592_v22 = vpop.permute.xlu0 %591  ;;  %v441_v36 = vadd.f32 %v2378_v15, %v440_v62 }
 0x1b2   :  { %v2510_v14 = vpop.trf.xlu1 }
 0x1b3   :  { %v863_v32 = vadd.f32 %v565_v20, %v2510_v14  ;;  %v867_v59 = vadd.f32 %v584_v61, %v2510_v14  ;;  %v871_v6 = vadd.f32 %v2413_v52, %v2510_v14  ;;  %v875_v56 = vadd.f32 %v2437_v9, %v2510_v14 }
 0x1b4   :  { %v446_v61 = vadd.f32 %v1764_v44, %v2378_v15 }
 0x1b5   :  { %531 = vxpose.xlu0.b32.cont [5/16] (narrow) %v431_v50, 32  ;;  %v626_v51 = vpop.permute.xlu0 %625  ;;  %v1767_v50 = vpop.f32.mrf.mxu1  ;;  %1855 = vtanh.f32 %v863_v32 }
 0x1b6   :  { %v2513_v63 = vpop.trf.xlu1  ;;  %1857 = vtanh.f32 %v867_v59  ;;  %v456_v59 = vadd.f32 %v1767_v50, %v2378_v15 }
 0x1b7   :  { %v868_v20 = vadd.f32 %v588_v13, %v2513_v63  ;;  %1859 = vtanh.f32 %v871_v6  ;;  %v872_v52 = vadd.f32 %v2421_v57, %v2513_v63  ;;  %v450_v62 = vpop.f32.mrf.mxu1  ;;  %v883_v57 = vadd.f32 %v2466_v7, %v2510_v14 }
 0x1b8   :  { %1861 = vtanh.f32 %v875_v56  ;;  %v451_v6 = vadd.f32 %v2378_v15, %v450_v62  ;;  %v876_v7 = vadd.f32 %v626_v51, %v2513_v63  ;;  %v880_v50 = vadd.f32 %v2453_v1, %v2513_v63 }
 0x1b9   :  { %532 = vxpose.xlu0.b32.cont [6/16] (narrow) %v436_v4, 32  ;;  %v641_v37 = vpop.permute.xlu0 %640  ;;  %v864_v4 = vadd.f32 %v2429_v0, %v2513_v63  ;;  %v1770_v56 = vpop.f32.mrf.mxu1  ;;  %v892_v51 = vadd.f32 %v2494_v48, %v2513_v63 }
 0x1ba   :  { %v2521_v54 = vpop.trf.xlu1  ;;  %v466_v48 = vadd.f32 %v1770_v56, %v2378_v15 }
 0x1bb   :  { %v869_v21 = vadd.f32 %v592_v22, %v2521_v54  ;;  %1863 = vtanh.f32 %v864_v4  ;;  %v873_v32 = vadd.f32 %v2445_v18, %v2521_v54  ;;  %v893_v1 = vadd.f32 %v2504_v3, %v2521_v54 }
 0x1bc   :  { %1865 = vtanh.f32 %v868_v20 }
 0x1bd   :  { %533 = vxpose.xlu0.b32.cont [7/16] (narrow) %v441_v36, 32  ;;  %v573_v17 = vpop.permute.xlu0 %572  ;;  %1867 = vtanh.f32 %v872_v52  ;;  %v879_v52 = vadd.f32 %v641_v37, %v2510_v14 }
 0x1be   :  { %v2534_v0 = vpop.trf.xlu1  ;;  %v865_v44 = vadd.f32 %v573_v17, %v2521_v54  ;;  %1869 = vtanh.f32 %v869_v21  ;;  %v460_v17 = vpop.f32.mrf.mxu1  ;;  %v887_v21 = vadd.f32 %v2479_v39, %v2510_v14 }
 0x1bf   :  { %v870_v22 = vadd.f32 %v2459_v5, %v2534_v0  ;;  %1871 = vtanh.f32 %v873_v32  ;;  %v874_v18 = vadd.f32 %v2472_v8, %v2534_v0  ;;  %v866_v36 = vadd.f32 %v2483_v40, %v2534_v0 }
 0x1c0   :  { %1873 = vtanh.f32 %v865_v44  ;;  %v461_v40 = vadd.f32 %v2378_v15, %v460_v17  ;;  %v1773_v20 = vpop.f32.mrf.mxu1  ;;  %v894_v44 = vadd.f32 %v2507_v47, %v2534_v0 }
 0x1c1   :  { %534 = vxpose.xlu0.b32.cont [8/16] (narrow) %v446_v61, 32  ;;  %v630_v9 = vpop.permute.xlu0 %629  ;;  %1875 = vtanh.f32 %v883_v57  ;;  %v476_v56 = vadd.f32 %v1773_v20, %v2378_v15 }
 0x1c2   :  { %1877 = vtanh.f32 %v870_v22  ;;  %v877_v4 = vadd.f32 %v630_v9, %v2521_v54  ;;  %v1856_v8 = vpop.eup %1855  ;;  %v470_v57 = vpop.f32.mrf.mxu1 }
 0x1c3   :  { %1879 = vtanh.f32 %v874_v18  ;;  %v1858_v61 = vpop.eup %1857  ;;  %v471_v17 = vadd.f32 %v2378_v15, %v470_v57 }
 0x1c4   :  { %1881 = vtanh.f32 %v866_v36  ;;  %v1860_v39 = vpop.eup %1859 }
 0x1c5   :  { %535 = vxpose.xlu0.b32.cont [9/16] (narrow) %v451_v6, 32  ;;  %v664_v13 = vpop.permute.xlu0 %663  ;;  %1883 = vtanh.f32 %v876_v7  ;;  %v2557_v9 = vpop.eup %1861 }
 0x1c6   :  { %1885 = vtanh.f32 %v887_v21  ;;  %v884_v37 = vadd.f32 %v664_v13, %v2513_v63  ;;  %v1776_v21 = vpop.f32.mrf.mxu1  ;;  %v1015_v13 = vmul.f32 %v1858_v61, %v2381_v19  ;;  %v1011_v61 = vmul.f32 %v1856_v8, %v2381_v19 }
 0x1c7   :  { %1887 = vtanh.f32 %v877_v4 }
 0x1c8   :  { %v1864_v32 = vpop.eup %1863  ;;  %1889 = vtanh.f32 %v880_v50  ;;  %v885_v50 = vadd.f32 %v2490_v12, %v2521_v54  ;;  %v480_v57 = vpop.f32.mrf.mxu1 }
 0x1c9   :  { %536 = vxpose.xlu0.b32.cont [10/16] (narrow) %v456_v59, 32  ;;  %v649_v5 = vpop.permute.xlu0 %648  ;;  %v1866_v6 = vpop.eup %1865  ;;  %1891 = vtanh.f32 %v892_v51 }
 0x1ca   :  { %v1868_v22 = vpop.eup %1867  ;;  %1893 = vtanh.f32 %v879_v52  ;;  %v881_v3 = vadd.f32 %v649_v5, %v2521_v54  ;;  %v1016_v47 = vmul.f32 %v1866_v6, %v2397_v41 }
 0x1cb   :  { %v1870_v59 = vpop.eup %1869  ;;  %1895 = vtanh.f32 %v893_v1  ;;  %v1020_v1 = vmul.f32 %v1868_v22, %v2397_v41 }
 0x1cc   :  { %v1872_v7 = vpop.eup %1871  ;;  %1897 = vtanh.f32 %v894_v44  ;;  %v1017_v20 = vmul.f32 %v1870_v59, %v2405_v46 }
 0x1cd   :  { %537 = vxpose.xlu0.b32.cont [11/16] (narrow) %v461_v40, 32  ;;  %v683_v62 = vpop.permute.xlu0 %682  ;;  %v1874_v4 = vpop.eup %1873  ;;  %v1012_v40 = vmul.f32 %v1864_v32, %v2397_v41  ;;  %v1019_v32 = vmul.f32 %v1860_v39, %v2381_v19 }
 0x1ce   :  { %v2574_v5 = vpop.eup %1875  ;;  %v888_v51 = vadd.f32 %v683_v62, %v2513_v63  ;;  %v1013_v6 = vmul.f32 %v1874_v4, %v2405_v46  ;;  %v1021_v62 = vmul.f32 %v1872_v7, %v2405_v46  ;;  %v481_v7 = vadd.f32 %v2378_v15, %v480_v57 }
 0x1cf   :  { %v1878_v44 = vpop.eup %1877  ;;  %v1075_v59 = vadd.f32 %v1012_v40, %v1011_v61  ;;  %v1093_v39 = vadd.f32 %v1020_v1, %v1019_v32 }
 0x1d0   :  { %v1018_v63 = vmul.f32 %v1878_v44, %v2386_v31 }
 0x1d1   :  { %538 = vxpose.xlu0.b32.cont [12/16] (narrow) %v466_v48, 32  ;;  %v634_v18 = vpop.permute.xlu0 %633  ;;  %v1880_v48 = vpop.eup %1879 }
 0x1d2   :  { %v878_v36 = vadd.f32 %v634_v18, %v2534_v0  ;;  %v1882_v18 = vpop.eup %1881 }
 0x1d3   :  { %v1884_v22 = vpop.eup %1883  ;;  %v1014_v40 = vmul.f32 %v1882_v18, %v2386_v31 }
 0x1d4   :  { %1899 = vtanh.f32 %v878_v36  ;;  %v2586_v36 = vpop.eup %1885 }
 0x1d5   :  { %1901 = vtanh.f32 %v884_v37  ;;  %539 = vxpose.xlu0.b32.cont [13/16] (narrow) %v471_v17, 32  ;;  %v698_v52 = vpop.permute.xlu0 %697  ;;  %v1084_v37 = vadd.f32 %v1016_v47, %v1015_v13  ;;  %v889_v17 = vadd.f32 %v2500_v58, %v2521_v54  ;;  %v1888_v4 = vpop.eup %1887  ;;  %v1076_v13 = vadd.f32 %v1075_v59, %v1013_v6 }
 0x1d6   :  { %1903 = vtanh.f32 %v881_v3  ;;  %v891_v12 = vadd.f32 %v698_v52, %v2510_v14  ;;  %v1022_v14 = vmul.f32 %v1880_v48, %v2386_v31  ;;  %v1890_v52 = vpop.eup %1889  ;;  %v1023_v54 = vmul.f32 %v2557_v9, %v2381_v19 }
 0x1d7   :  { %v1085_v3 = vadd.f32 %v1084_v37, %v1017_v20  ;;  %v1024_v20 = vmul.f32 %v1884_v22, %v2397_v41  ;;  %v1892_v1 = vpop.eup %1891  ;;  %v486_v48 = vadd.f32 %v1776_v21, %v2378_v15  ;;  %v1077_v6 = vadd.f32 %v1076_v13, %v1014_v40 }
 0x1d8   :  { %1905 = vtanh.f32 %v891_v12  ;;  %v1894_v58 = vpop.eup %1893  ;;  %v1040_v13 = vmul.f32 %v1892_v1, %v2397_v41 }
 0x1d9   :  { %1907 = vtanh.f32 %v888_v51  ;;  %540 = vxpose.xlu0.b32.cont [14/16] (narrow) %v476_v56, 32  ;;  %v653_v8 = vpop.permute.xlu0 %652  ;;  %v1086_v56 = vadd.f32 %v1085_v3, %v1018_v63  ;;  %v1094_v51 = vadd.f32 %v1093_v39, %v1021_v62  ;;  %v1896_v32 = vpop.eup %1895  ;;  %v1102_v62 = vadd.f32 %v1024_v20, %v1023_v54 }
 0x1da   :  { %1909 = vtanh.f32 %v885_v50  ;;  %v882_v47 = vadd.f32 %v653_v8, %v2534_v0  ;;  %v1025_v50 = vmul.f32 %v1888_v4, %v2405_v46  ;;  %v1898_v63 = vpop.eup %1897  ;;  %v1078_v39 = vrot.slane %v1077_v6, 4 }
 0x1db   :  { %v1095_v61 = vadd.f32 %v1094_v51, %v1022_v14  ;;  %v1087_v57 = vrot.slane %v1086_v56, 4  ;;  %v1027_v15 = vmul.f32 %v1894_v58, %v2381_v19  ;;  %v1041_v1 = vmul.f32 %v1896_v32, %v2405_v46 }
 0x1dc   :  { %1911 = vtanh.f32 %v882_v47  ;;  %v1103_v8 = vadd.f32 %v1102_v62, %v1025_v50  ;;  %v1028_v47 = vmul.f32 %v1890_v52, %v2397_v41  ;;  %v1079_v58 = vadd.f32 %v1078_v39, %v1077_v6 }
 0x1dd   :  { %541 = vxpose.xlu0.b32.cont [15/16] (narrow) %v481_v7, 32  ;;  %v672_v44 = vpop.permute.xlu0 %671  ;;  %1913 = vtanh.f32 %v889_v17  ;;  %v1096_v59 = vrot.slane %v1095_v61, 4  ;;  %v1088_v17 = vadd.f32 %v1087_v57, %v1086_v56  ;;  %v1031_v56 = vmul.f32 %v2574_v5, %v2381_v19 }
 0x1de   :  { %v886_v12 = vadd.f32 %v672_v44, %v2534_v0  ;;  %v1111_v52 = vadd.f32 %v1028_v47, %v1027_v15  ;;  %v1035_v32 = vmul.f32 %v2586_v36, %v2381_v19 }
 0x1df   :  { %v1097_v40 = vadd.f32 %v1096_v59, %v1095_v61  ;;  %v1089_v50 = vrot.slane %v1088_v17, 2 }
 0x1e0   :  { %1915 = vtanh.f32 %v886_v12  ;;  %v2066_v12 = vmov 0.0  }
 0x1e1   :  { %v1900_v37 = vpop.eup %1899  ;;  %542 = vxpose.xlu0.b32.end [16/16] (narrow) %v486_v48, 32  ;;  %v691_v18 = vpop.permute.xlu0 %690  ;;  %1777 = vmatprep.subr.mxu0 %v2066_v12 }
 0x1e2   :  { %v1902_v22 = vpop.eup %1901  ;;  %v1026_v9 = vmul.f32 %v1900_v37, %v2386_v31  ;;  %v890_v14 = vadd.f32 %v691_v18, %v2534_v0  ;;  %1778 = vmatpush3.msra.mxu0 %v2244_v30  ;;  %v1042_v37 = vmul.f32 %v1898_v63, %v2386_v31  ;;  %v1098_v18 = vrot.slane %v1097_v40, 2  ;;  %1809 = vmatprep.mubr.msk.f32.mxu0 %vm2067_vm8, %v2066_v12 }
 0x1e3   :  { %v1904_v3 = vpop.eup %1903  ;;  %v1032_v4 = vmul.f32 %v1902_v22, %v2397_v41  ;;  %1779 = vmatprep.subr.mxu0 %v2066_v12  ;;  %v1080_v30 = vrot.slane %v1079_v58, 2 }
 0x1e4   :  { %v1104_v21 = vadd.f32 %v1103_v8, %v1026_v9  ;;  %1917 = vtanh.f32 %v890_v14  ;;  %v1029_v20 = vmul.f32 %v1904_v3, %v2405_v46  ;;  %1780 = vmatpush3.msra.mxu0 %v2235_v29  ;;  %v1090_v9 = vadd.f32 %v1089_v50, %v1088_v17 }
 0x1e5   :  { %v1906_v7 = vpop.eup %1905  ;;  %v1120_v5 = vadd.f32 %v1032_v4, %v1031_v56  ;;  %1781 = vmatprep.subr.mxu0 %v2066_v12 }
 0x1e6   :  { %v1908_v51 = vpop.eup %1907  ;;  %v1105_v44 = vrot.slane %v1104_v21, 4  ;;  %v1039_v0 = vmul.f32 %v1906_v7, %v2381_v19  ;;  %v1112_v6 = vadd.f32 %v1111_v52, %v1029_v20  ;;  %1782 = vmatpush3.msra.mxu0 %v2230_v28  ;;  %v1099_v7 = vadd.f32 %v1098_v18, %v1097_v40 }
 0x1e7   :  { %v1910_v54 = vpop.eup %1909  ;;  %v1036_v62 = vmul.f32 %v1908_v51, %v2397_v41  ;;  %1783 = vmatprep.subr.mxu0 %v2066_v12  ;;  %v1091_v51 = vrot.slane %v1090_v9, 1 }
 0x1e8   :  { %v1106_v48 = vadd.f32 %v1105_v44, %v1104_v21  ;;  %v1138_v57 = vadd.f32 %v1040_v13, %v1039_v0  ;;  %v1033_v3 = vmul.f32 %v1910_v54, %v2405_v46  ;;  %1784 = vmatpush3.msra.mxu0 %v2221_v27  ;;  %v1081_v13 = vadd.f32 %v1080_v30, %v1079_v58 }
 0x1e9   :  { %v1912_v61 = vpop.eup %1911  ;;  %v1129_v21 = vadd.f32 %v1036_v62, %v1035_v32  ;;  %1785 = vmatprep.subr.mxu0 %v2066_v12  ;;  %v1100_v56 = vrot.slane %v1099_v7, 1 }
 0x1ea   :  { %v1030_v59 = vmul.f32 %v1912_v61, %v2386_v31  ;;  %v1139_v22 = vadd.f32 %v1138_v57, %v1041_v1  ;;  %v1107_v8 = vrot.slane %v1106_v48, 2  ;;  %v1914_v14 = vpop.eup %1913  ;;  %v1121_v47 = vadd.f32 %v1120_v5, %v1033_v3  ;;  %1786 = vmatpush3.msra.mxu0 %v2216_v26  ;;  %v1632_v26 = vld [vmem:[%s2912_s2] ss:$0 sm:$0xff] }
 0x1eb   :  { %v1037_v17 = vmul.f32 %v1914_v14, %v2405_v46  ;;  %1787 = vmatprep.subr.mxu0 %v2066_v12  ;;  %v1082_v58 = vrot.slane %v1081_v13, 1  ;;  %v1101_v5 = vadd.f32 %v1100_v56, %v1099_v7 }
 0x1ec   :  { %v1113_v63 = vadd.f32 %v1112_v6, %v1030_v59  ;;  %v1140_v39 = vadd.f32 %v1139_v22, %v1042_v37  ;;  %v1108_v20 = vadd.f32 %v1107_v8, %v1106_v48  ;;  %1788 = vmatpush3.msra.mxu0 %v2207_v25  ;;  %v1092_v48 = vadd.f32 %v1091_v51, %v1090_v9 }
 0x1ed   :  { %v1916_v15 = vpop.eup %1915  ;;  %v1130_v54 = vadd.f32 %v1129_v21, %v1037_v17  ;;  %1789 = vmatprep.subr.mxu0 %v2066_v12  ;;  %v1083_v22 = vadd.f32 %v1082_v58, %v1081_v13  ;;  %v2021_v17 = vld [vmem:[%s2911_s1 + $0x28] sm:$0xff] }
 0x1ee   :  { %v1114_v29 = vrot.slane %v1113_v63, 4  ;;  %v1034_v36 = vmul.f32 %v1916_v15, %v2386_v31  ;;  %v1141_v4 = vrot.slane %v1140_v39, 4  ;;  %v1109_v1 = vrot.slane %v1108_v20, 1  ;;  %1790 = vmatpush3.msra.mxu0 %v2202_v24  ;;  %v2019_v24 = vld [vmem:[%s2911_s1 + $0x38] sm:$0xff]  ;;  %v2020_v15 = vld [vmem:[%s2911_s1 + $0x30] sm:$0xff] }
 0x1ef   :  { %1791 = vmatprep.subr.mxu0 %v2066_v12  ;;  %v2638_v8 = vadd.f32 %v1632_v26, %v1092_v48  ;;  %v2650_v21 = vadd.f32 %v1632_v26, %v1083_v22 }
 0x1f0   :  { %v1115_v28 = vadd.f32 %v1114_v29, %v1113_v63  ;;  %v1122_v44 = vadd.f32 %v1121_v47, %v1034_v36  ;;  %v1142_v0 = vadd.f32 %v1141_v4, %v1140_v39  ;;  %1792 = vmatpush3.msra.mxu0 %v2194_v23  ;;  %v1110_v32 = vadd.f32 %v1109_v1, %v1108_v20  ;;  %v2024_v1 = vld [vmem:[%s2911_s1 + $0x10] sm:$0xff] }
 0x1f1   :  { %v1918_v40 = vpop.eup %1917  ;;  %1793 = vmatprep.subr.mxu0 %v2066_v12  ;;  %v2645_v23 = vadd.f32 %v1632_v26, %v1101_v5  ;;  %v1263_v29 = vrot.slane %v2638_v8, 7 }
 0x1f2   :  { %v1123_v50 = vrot.slane %v1122_v44, 4  ;;  %v1038_v27 = vmul.f32 %v1918_v40, %v2386_v31  ;;  %v1116_v52 = vrot.slane %v1115_v28, 2  ;;  %v1143_v57 = vrot.slane %v1142_v0, 2  ;;  %1794 = vmatpush3.msra.mxu0 %v2019_v24 }
 0x1f3   :  { %1795 = vmatprep.subr.mxu0 %v2066_v12  ;;  %v2652_v7 = vadd.f32 %v1632_v26, %v1110_v32  ;;  %v1265_v40 = vsel %vm1264_vm1, %v1263_v29, %v2650_v21 }
 0x1f4   :  { %v1131_v61 = vadd.f32 %v1130_v54, %v1038_v27  ;;  %v1117_v62 = vadd.f32 %v1116_v52, %v1115_v28  ;;  %v1124_v37 = vadd.f32 %v1123_v50, %v1122_v44  ;;  %v1144_v18 = vadd.f32 %v1143_v57, %v1142_v0  ;;  %1796 = vmatpush3.msra.mxu0 %v2020_v15  ;;  %v2022_v44 = vld [vmem:[%s2911_s1 + $0x20] sm:$0xff]  ;;  %v2668_v0 = vpop.permute.xlu0 %804  ;;  %v2023_v27 = vld [vmem:[%s2911_s1 + $0x18] sm:$0xff] }
 0x1f5   :  { %1797 = vmatprep.subr.mxu0 %v2066_v12  ;;  %v1266_v28 = vrot.slane %v2645_v23, 6  ;;  %v1269_v54 = vrot.slane %v2652_v7, 5 }
 0x1f6   :  { %v1118_v6 = vrot.slane %v1117_v62, 1  ;;  %v1125_v25 = vrot.slane %v1124_v37, 2  ;;  %v1132_v59 = vrot.slane %v1131_v61, 4  ;;  %v1145_v63 = vrot.slane %v1144_v18, 1  ;;  %1798 = vmatpush3.msra.mxu0 %v2021_v17 }
 0x1f7   :  { %1799 = vmatprep.subr.mxu0 %v2066_v12  ;;  %v1268_v48 = vsel %vm1267_vm2, %v1266_v28, %v1265_v40 }
 0x1f8   :  { %v1119_v30 = vadd.f32 %v1118_v6, %v1117_v62  ;;  %v1126_v9 = vadd.f32 %v1125_v25, %v1124_v37  ;;  %v1133_v14 = vadd.f32 %v1132_v59, %v1131_v61  ;;  %v1146_v13 = vadd.f32 %v1145_v63, %v1144_v18  ;;  %1800 = vmatpush3.msra.mxu0 %v2022_v44  ;;  %v2695_v18 = vpop.permute.xlu0 %838  ;;  %v2026_v59 = vld [vmem:[%s2911_s1] sm:$0xff]  ;;  %v2930_v44 = vld [vmem:[#allocation5_spill] sm:$0xff] }
 0x1f9   :  { %1801 = vmatprep.subr.mxu0 %v2066_v12  ;;  %v1271_v61 = vsel %vm1270_vm3, %v1269_v54, %v1268_v48 }
 0x1fa   :  { %v1127_v3 = vrot.slane %v1126_v9, 1  ;;  %v1134_v39 = vrot.slane %v1133_v14, 2  ;;  %v2656_v4 = vadd.f32 %v1632_v26, %v1119_v30  ;;  %1802 = vmatpush3.msra.mxu0 %v2023_v27  ;;  %v2678_v52 = vadd.f32 %v1632_v26, %v1146_v13 }
 0x1fb   :  { %1803 = vmatprep.subr.mxu0 %v2066_v12 }
 0x1fc   :  { %v1128_v47 = vadd.f32 %v1127_v3, %v1126_v9  ;;  %v1135_v36 = vadd.f32 %v1134_v39, %v1133_v14  ;;  %v1272_v50 = vrot.slane %v2656_v4, 4  ;;  %1804 = vmatpush3.msra.mxu0 %v2024_v1  ;;  %v1281_v6 = vrot.slane %v2678_v52, 1  ;;  %v2706_v32 = vpop.permute.xlu0 %823  ;;  %v2934_v1 = vld [vmem:[#allocation14_spill] sm:$0xff] }
 0x1fd   :  { %1805 = vmatprep.subr.mxu0 %v2066_v12 }
 0x1fe   :  { %v1136_v51 = vrot.slane %v1135_v36, 1  ;;  %v2662_v20 = vadd.f32 %v1632_v26, %v1128_v47  ;;  %v1274_v62 = vsel %vm1273_vm4, %v1272_v50, %v1271_v61 }
 0x200   :  { %v1137_v56 = vadd.f32 %v1136_v51, %v1135_v36  ;;  %v1275_v57 = vrot.slane %v2662_v20, 3  ;;  %v858_v30 = vpop.permute.xlu0 %857 }
 0x202   :  { %v2682_v58 = vadd.f32 %v1632_v26, %v1137_v56  ;;  %v2025_v26 = vld [vmem:[%s2911_s1 + $0x8] sm:$0xff]  ;;  %v1277_v5 = vsel %vm1276_vm5, %v1275_v57, %v1274_v62  ;;  %v2932_v56 = vld [vmem:[#allocation9_spill] sm:$0xff] }
 0x203   :  { %1806 = vmatpush3.msra.mxu0 %v2025_v26 }
 0x204   :  { %v1278_v37 = vrot.slane %v2682_v58, 2  ;;  %1807 = vmatprep.subr.mxu0 %v2066_v12  ;;  %v2708_v9 = vpop.permute.xlu0 %842 }
 0x205   :  { %1808 = vmatpush3.msra.mxu0 %v2026_v59  ;;  %v2935_v59 = vld [vmem:[#allocation12_spill] sm:$0xff] }
 0x206   :  { %v1280_v25 = vsel %vm1279_vm6, %v1278_v37, %v1277_v5  ;;  %1812 = vmatprep.subr.mxu0 %v2066_v12 }
 0x207   :  { %v1283_v22 = vsel %vm1282_vm7, %v1281_v6, %v1280_v25 }
 0x208   :  { %1300 = vmax.xlane.f32.xlu1 %v1283_v22  ;;  %v2712_v14 = vpop.permute.xlu0 %861 }
 0x221   :  { %v543_v24 = vpop.trf.xlu0 }
 0x222   :  { %v895_v63 = vadd.f32 %v2409_v49, %v543_v24  ;;  %v899_v3 = vadd.f32 %v2389_v35, %v543_v24  ;;  %v903_v39 = vadd.f32 %v2399_v42, %v543_v24  ;;  %v907_v15 = vadd.f32 %v2425_v60, %v543_v24 }
 0x223   :  { %v911_v29 = vadd.f32 %v2441_v16, %v543_v24  ;;  %v915_v47 = vadd.f32 %v2464_v33, %v543_v24  ;;  %v919_v17 = vadd.f32 %v2481_v11, %v543_v24  ;;  %v923_v13 = vadd.f32 %v2498_v55, %v543_v24  ;;  %v854_v55 = vpop.permute.xlu1 %853 }
 0x224   :  { %1919 = vtanh.f32 %v895_v63  ;;  %v2936_v63 = vld [vmem:[#allocation8_spill] sm:$0xff] }
 0x225   :  { %1921 = vtanh.f32 %v899_v3  ;;  %v544_v36 = vpop.trf.xlu0 }
 0x226   :  { %1923 = vtanh.f32 %v903_v39  ;;  %v896_v35 = vadd.f32 %v2415_v53, %v544_v36  ;;  %v900_v42 = vadd.f32 %v2393_v38, %v544_v36  ;;  %v904_v49 = vadd.f32 %v2403_v45, %v544_v36  ;;  %v2929_v38 = vld [vmem:[#allocation7_spill] sm:$0xff] }
 0x227   :  { %1925 = vtanh.f32 %v907_v15  ;;  %v908_v60 = vadd.f32 %v2431_v2, %v544_v36  ;;  %v912_v16 = vadd.f32 %v2447_v10, %v544_v36  ;;  %v916_v33 = vadd.f32 %v2469_v34, %v544_v36  ;;  %v2931_v10 = vld [vmem:[#allocation6_spill] sm:$0xff] }
 0x228   :  { %1927 = vtanh.f32 %v911_v29  ;;  %v920_v51 = vadd.f32 %v2486_v43, %v544_v36  ;;  %v924_v53 = vadd.f32 %v854_v55, %v544_v36  ;;  %v2933_v43 = vld [vmem:[#allocation11_spill] sm:$0xff]  ;;  %v2937_v15 = vld [vmem:[#allocation10_spill] sm:$0xff]  ;;  %v2938_v36 = vld [vmem:[#allocation13_spill] sm:$0xff] }
 0x229   :  { %1929 = vtanh.f32 %v915_v47  ;;  %v545_v11 = vpop.trf.xlu0 }
 0x22a   :  { %1931 = vtanh.f32 %v919_v17  ;;  %v897_v28 = vadd.f32 %v2929_v38, %v545_v11  ;;  %v901_v2 = vadd.f32 %v2930_v44, %v545_v11  ;;  %v905_v54 = vadd.f32 %v2931_v10, %v545_v11 }
 0x22b   :  { %1933 = vtanh.f32 %v923_v13  ;;  %v909_v50 = vadd.f32 %v2932_v56, %v545_v11  ;;  %v913_v57 = vadd.f32 %v2933_v43, %v545_v11  ;;  %v917_v61 = vadd.f32 %v2934_v1, %v545_v11 }
 0x22c   :  { %1935 = vtanh.f32 %v896_v35  ;;  %v921_v26 = vadd.f32 %v2695_v18, %v545_v11  ;;  %v925_v6 = vadd.f32 %v858_v30, %v545_v11 }
 0x22d   :  { %1937 = vtanh.f32 %v900_v42  ;;  %v546_v62 = vpop.trf.xlu0 }
 0x22e   :  { %1939 = vtanh.f32 %v904_v49  ;;  %v898_v22 = vadd.f32 %v2935_v59, %v546_v62  ;;  %v902_v3 = vadd.f32 %v2936_v63, %v546_v62  ;;  %v906_v29 = vadd.f32 %v2937_v15, %v546_v62 }
 0x22f   :  { %1941 = vtanh.f32 %v908_v60  ;;  %v910_v18 = vadd.f32 %v2938_v36, %v546_v62  ;;  %v914_v30 = vadd.f32 %v2668_v0, %v546_v62  ;;  %v918_v35 = vadd.f32 %v2706_v32, %v546_v62 }
 0x230   :  { %1943 = vtanh.f32 %v912_v16  ;;  %v922_v49 = vadd.f32 %v2708_v9, %v546_v62  ;;  %v926_v16 = vadd.f32 %v2712_v14, %v546_v62 }
 0x231   :  { %v1920_v45 = vpop.eup %1919  ;;  %1945 = vtanh.f32 %v916_v33 }
 0x232   :  { %v1922_v40 = vpop.eup %1921  ;;  %1947 = vtanh.f32 %v920_v51  ;;  %v1043_v0 = vmul.f32 %v1920_v45, %v2381_v19 }
 0x233   :  { %v1924_v34 = vpop.eup %1923  ;;  %1949 = vtanh.f32 %v924_v53  ;;  %v1047_v32 = vmul.f32 %v1922_v40, %v2381_v19 }
 0x234   :  { %v1926_v27 = vpop.eup %1925  ;;  %1951 = vtanh.f32 %v897_v28  ;;  %v1051_v14 = vmul.f32 %v1924_v34, %v2381_v19 }
 0x235   :  { %v1928_v48 = vpop.eup %1927  ;;  %1953 = vtanh.f32 %v901_v2  ;;  %v1055_v44 = vmul.f32 %v1926_v27, %v2381_v19 }
 0x236   :  { %v1930_v37 = vpop.eup %1929  ;;  %1955 = vtanh.f32 %v905_v54  ;;  %v1059_v45 = vmul.f32 %v1928_v48, %v2381_v19 }
 0x237   :  { %v1932_v5 = vpop.eup %1931  ;;  %1957 = vtanh.f32 %v909_v50  ;;  %v1063_v40 = vmul.f32 %v1930_v37, %v2381_v19 }
 0x238   :  { %v1934_v25 = vpop.eup %1933  ;;  %1959 = vtanh.f32 %v913_v57  ;;  %v1067_v34 = vmul.f32 %v1932_v5, %v2381_v19 }
 0x239   :  { %v1936_v24 = vpop.eup %1935  ;;  %1961 = vtanh.f32 %v917_v61  ;;  %v1071_v27 = vmul.f32 %v1934_v25, %v2381_v19 }
 0x23a   :  { %v1938_v39 = vpop.eup %1937  ;;  %1963 = vtanh.f32 %v921_v26  ;;  %v1044_v9 = vmul.f32 %v1936_v24, %v2397_v41 }
 0x23b   :  { %v1940_v47 = vpop.eup %1939  ;;  %1965 = vtanh.f32 %v925_v6  ;;  %v1048_v53 = vmul.f32 %v1938_v39, %v2397_v41 }
 0x23c   :  { %v1942_v17 = vpop.eup %1941  ;;  %1967 = vtanh.f32 %v898_v22  ;;  %v1052_v28 = vmul.f32 %v1940_v47, %v2397_v41  ;;  %v1147_v62 = vadd.f32 %v1044_v9, %v1043_v0 }
 0x23d   :  { %v1944_v13 = vpop.eup %1943  ;;  %1969 = vtanh.f32 %v902_v3  ;;  %v1056_v2 = vmul.f32 %v1942_v17, %v2397_v41  ;;  %v1156_v26 = vadd.f32 %v1048_v53, %v1047_v32 }
 0x23e   :  { %v1946_v42 = vpop.eup %1945  ;;  %1971 = vtanh.f32 %v906_v29  ;;  %v1060_v54 = vmul.f32 %v1944_v13, %v2397_v41  ;;  %v1165_v22 = vadd.f32 %v1052_v28, %v1051_v14 }
 0x23f   :  { %v1948_v60 = vpop.eup %1947  ;;  %1973 = vtanh.f32 %v910_v18  ;;  %v1064_v56 = vmul.f32 %v1946_v42, %v2397_v41  ;;  %v1174_v24 = vadd.f32 %v1056_v2, %v1055_v44 }
 0x240   :  { %v1950_v33 = vpop.eup %1949  ;;  %1975 = vtanh.f32 %v914_v30  ;;  %v1068_v57 = vmul.f32 %v1948_v60, %v2397_v41  ;;  %v1183_v19 = vadd.f32 %v1060_v54, %v1059_v45 }
 0x241   :  { %v1952_v11 = vpop.eup %1951  ;;  %1977 = vtanh.f32 %v918_v35  ;;  %v1072_v48 = vmul.f32 %v1950_v33, %v2397_v41  ;;  %v1192_v25 = vadd.f32 %v1064_v56, %v1063_v40 }
 0x242   :  { %v1954_v55 = vpop.eup %1953  ;;  %1979 = vtanh.f32 %v922_v49  ;;  %v1045_v43 = vmul.f32 %v1952_v11, %v2405_v46  ;;  %v1201_v47 = vadd.f32 %v1068_v57, %v1067_v34 }
 0x243   :  { %v1956_v51 = vpop.eup %1955  ;;  %1981 = vtanh.f32 %v926_v16  ;;  %v1049_v61 = vmul.f32 %v1954_v55, %v2405_v46  ;;  %v1210_v13 = vadd.f32 %v1072_v48, %v1071_v27 }
 0x244   :  { %v1958_v38 = vpop.eup %1957  ;;  %v1053_v37 = vmul.f32 %v1956_v51, %v2405_v46  ;;  %v1148_v29 = vadd.f32 %v1147_v62, %v1045_v43 }
 0x245   :  { %v1960_v10 = vpop.eup %1959  ;;  %v1057_v59 = vmul.f32 %v1958_v38, %v2405_v46  ;;  %v1157_v30 = vadd.f32 %v1156_v26, %v1049_v61 }
 0x246   :  { %v1962_v50 = vpop.eup %1961  ;;  %v1061_v5 = vmul.f32 %v1960_v10, %v2405_v46  ;;  %v1166_v60 = vadd.f32 %v1165_v22, %v1053_v37 }
 0x247   :  { %v1964_v1 = vpop.eup %1963  ;;  %v1065_v3 = vmul.f32 %v1962_v50, %v2405_v46  ;;  %v1175_v16 = vadd.f32 %v1174_v24, %v1057_v59 }
 0x248   :  { %v1966_v6 = vpop.eup %1965  ;;  %v1069_v41 = vmul.f32 %v1964_v1, %v2405_v46  ;;  %v1184_v0 = vadd.f32 %v1183_v19, %v1061_v5 }
 0x249   :  { %v1968_v63 = vpop.eup %1967  ;;  %v1073_v17 = vmul.f32 %v1966_v6, %v2405_v46  ;;  %v1193_v51 = vadd.f32 %v1192_v25, %v1065_v3 }
 0x24a   :  { %v1970_v39 = vpop.eup %1969  ;;  %v1046_v15 = vmul.f32 %v1968_v63, %v2386_v31  ;;  %v1202_v46 = vadd.f32 %v1201_v47, %v1069_v41 }
 0x24b   :  { %v1972_v36 = vpop.eup %1971  ;;  %v1050_v18 = vmul.f32 %v1970_v39, %v2386_v31  ;;  %v1211_v10 = vadd.f32 %v1210_v13, %v1073_v17 }
 0x24c   :  { %v1974_v35 = vpop.eup %1973  ;;  %v1054_v42 = vmul.f32 %v1972_v36, %v2386_v31  ;;  %v1149_v49 = vadd.f32 %v1148_v29, %v1046_v15 }
 0x24d   :  { %v1976_v33 = vpop.eup %1975  ;;  %v1058_v11 = vmul.f32 %v1974_v35, %v2386_v31  ;;  %v1158_v55 = vadd.f32 %v1157_v30, %v1050_v18  ;;  %v1633_v30 = vld [vmem:[%s2912_s2 + $0x1] ss:$0 sm:$0xff] }
 0x24e   :  { %v1978_v32 = vpop.eup %1977  ;;  %v1062_v53 = vmul.f32 %v1976_v33, %v2386_v31  ;;  %v1150_v9 = vrot.slane %v1149_v49, 4  ;;  %v1167_v38 = vadd.f32 %v1166_v60, %v1054_v42 }
 0x24f   :  { %v1980_v14 = vpop.eup %1979  ;;  %v1066_v28 = vmul.f32 %v1978_v32, %v2386_v31  ;;  %v1159_v44 = vrot.slane %v1158_v55, 4  ;;  %v1176_v2 = vadd.f32 %v1175_v16, %v1058_v11 }
 0x250   :  { %v1982_v45 = vpop.eup %1981  ;;  %v1070_v54 = vmul.f32 %v1980_v14, %v2386_v31  ;;  %v1151_v40 = vadd.f32 %v1150_v9, %v1149_v49  ;;  %v1168_v56 = vrot.slane %v1167_v38, 4  ;;  %v1185_v50 = vadd.f32 %v1184_v0, %v1062_v53 }
 0x251   :  { %v1074_v43 = vmul.f32 %v1982_v45, %v2386_v31  ;;  %v1160_v34 = vadd.f32 %v1159_v44, %v1158_v55  ;;  %v1177_v57 = vrot.slane %v1176_v2, 4  ;;  %v1194_v27 = vadd.f32 %v1193_v51, %v1066_v28 }
 0x252   :  { %v1152_v1 = vrot.slane %v1151_v40, 2  ;;  %v1169_v61 = vadd.f32 %v1168_v56, %v1167_v38  ;;  %v1186_v48 = vrot.slane %v1185_v50, 4  ;;  %v1203_v62 = vadd.f32 %v1202_v46, %v1070_v54 }
 0x253   :  { %v1161_v26 = vrot.slane %v1160_v34, 2  ;;  %v1178_v6 = vadd.f32 %v1177_v57, %v1176_v2  ;;  %v1195_v37 = vrot.slane %v1194_v27, 4  ;;  %v1212_v59 = vadd.f32 %v1211_v10, %v1074_v43 }
 0x254   :  { %v1153_v22 = vadd.f32 %v1152_v1, %v1151_v40  ;;  %v1170_v24 = vrot.slane %v1169_v61, 2  ;;  %v1187_v63 = vadd.f32 %v1186_v48, %v1185_v50  ;;  %v1204_v5 = vrot.slane %v1203_v62, 4 }
 0x255   :  { %v1162_v3 = vadd.f32 %v1161_v26, %v1160_v34  ;;  %v1179_v19 = vrot.slane %v1178_v6, 2  ;;  %v1196_v25 = vadd.f32 %v1195_v37, %v1194_v27  ;;  %v1213_v39 = vrot.slane %v1212_v59, 4 }
 0x256   :  { %v1154_v31 = vrot.slane %v1153_v22, 1  ;;  %v1171_v15 = vadd.f32 %v1170_v24, %v1169_v61  ;;  %v1188_v41 = vrot.slane %v1187_v63, 2  ;;  %v1205_v29 = vadd.f32 %v1204_v5, %v1203_v62 }
 0x257   :  { %v1163_v47 = vrot.slane %v1162_v3, 1  ;;  %v1180_v36 = vadd.f32 %v1179_v19, %v1178_v6  ;;  %v1197_v18 = vrot.slane %v1196_v25, 2  ;;  %v1214_v17 = vadd.f32 %v1213_v39, %v1212_v59 }
 0x258   :  { %v1155_v13 = vadd.f32 %v1154_v31, %v1153_v22  ;;  %v1172_v35 = vrot.slane %v1171_v15, 1  ;;  %v1189_v42 = vadd.f32 %v1188_v41, %v1187_v63  ;;  %v1206_v49 = vrot.slane %v1205_v29, 2 }
 0x259   :  { %v1164_v60 = vadd.f32 %v1163_v47, %v1162_v3  ;;  %v1181_v16 = vrot.slane %v1180_v36, 1  ;;  %v1198_v33 = vadd.f32 %v1197_v18, %v1196_v25  ;;  %v1215_v11 = vrot.slane %v1214_v17, 2 }
 0x25a   :  { %v1173_v55 = vadd.f32 %v1172_v35, %v1171_v15  ;;  %v1190_v0 = vrot.slane %v1189_v42, 1  ;;  %v1207_v51 = vadd.f32 %v1206_v49, %v1205_v29  ;;  %v2781_v28 = vadd.f32 %v1633_v30, %v1155_v13 }
 0x25b   :  { %v1182_v32 = vadd.f32 %v1181_v16, %v1180_v36  ;;  %v1199_v53 = vrot.slane %v1198_v33, 1  ;;  %v1216_v9 = vadd.f32 %v1215_v11, %v1214_v17  ;;  %v2779_v38 = vadd.f32 %v1633_v30, %v1164_v60 }
 0x25c   :  { %v1191_v46 = vadd.f32 %v1190_v0, %v1189_v42  ;;  %v1208_v14 = vrot.slane %v1207_v51, 1  ;;  %v2783_v44 = vadd.f32 %v1633_v30, %v1173_v55 }
 0x25d   :  { %v1200_v2 = vadd.f32 %v1199_v53, %v1198_v33  ;;  %v1217_v10 = vrot.slane %v1216_v9, 1  ;;  %v2785_v45 = vadd.f32 %v1633_v30, %v1182_v32  ;;  %v1284_v54 = vrot.slane %v2779_v38, 7 }
 0x25e   :  { %v1209_v40 = vadd.f32 %v1208_v14, %v1207_v51  ;;  %v2788_v56 = vadd.f32 %v1633_v30, %v1191_v46  ;;  %v1286_v50 = vrot.slane %v2783_v44, 6 }
 0x25f   :  { %v1218_v43 = vadd.f32 %v1217_v10, %v1216_v9  ;;  %v2791_v34 = vadd.f32 %v1633_v30, %v1200_v2  ;;  %v1285_v57 = vsel %vm1264_vm1, %v1284_v54, %v2781_v28  ;;  %v1288_v27 = vrot.slane %v2785_v45, 5 }
 0x260   :  { %v2796_v1 = vadd.f32 %v1633_v30, %v1209_v40  ;;  %v1287_v61 = vsel %vm1267_vm2, %v1286_v50, %v1285_v57  ;;  %v1290_v48 = vrot.slane %v2788_v56, 4 }
 0x261   :  { %v2800_v62 = vadd.f32 %v1633_v30, %v1218_v43  ;;  %v1289_v26 = vsel %vm1270_vm3, %v1288_v27, %v1287_v61  ;;  %v1292_v6 = vrot.slane %v2791_v34, 3 }
 0x262   :  { %v1291_v37 = vsel %vm1273_vm4, %v1290_v48, %v1289_v26  ;;  %v1294_v59 = vrot.slane %v2796_v1, 2  ;;  %v2027_v48 = vld [vmem:[%s2911_s1 + $0xf8] sm:$0xff]  ;;  %v2028_v26 = vld [vmem:[%s2911_s1 + $0xf0] sm:$0xff] }
 0x263   :  { %v1293_v22 = vsel %vm1276_vm5, %v1292_v6, %v1291_v37  ;;  %v1296_v24 = vrot.slane %v2800_v62, 1  ;;  %v2029_v6 = vld [vmem:[%s2911_s1 + $0xe8] sm:$0xff]  ;;  %v2030_v37 = vld [vmem:[%s2911_s1 + $0xe0] sm:$0xff] }
 0x264   :  { %v1295_v63 = vsel %vm1279_vm6, %v1294_v59, %v1293_v22  ;;  %v2031_v59 = vld [vmem:[%s2911_s1 + $0xd8] sm:$0xff]  ;;  %v2032_v22 = vld [vmem:[%s2911_s1 + $0xd0] sm:$0xff] }
 0x265   :  { %v1297_v5 = vsel %vm1282_vm7, %v1296_v24, %v1295_v63  ;;  %v2033_v24 = vld [vmem:[%s2911_s1 + $0xc8] sm:$0xff]  ;;  %v2034_v63 = vld [vmem:[%s2911_s1 + $0xc0] sm:$0xff] }
 0x266   :  { %1302 = vmax.xlane.f32.xlu1 %v1297_v5  ;;  %v2035_v5 = vld [vmem:[%s2911_s1 + $0xb8] sm:$0xff] }
 0x291   :  { %v1301_v3 = vpop.xlane.xlu1 %1300 }
 0x292   :  { %v1306_v19 = vrot.slane %v1301_v3, 1  ;;  %v1307_v25 = vrot.slane %v1301_v3, 2  ;;  %v1308_v39 = vrot.slane %v1301_v3, 3  ;;  %v1309_v31 = vrot.slane %v1301_v3, 4 }
 0x293   :  { %v1336_v15 = vsub.f32 %v2650_v21, %v1301_v3  ;;  %v1310_v41 = vrot.slane %v1301_v3, 5  ;;  %v1311_v29 = vrot.slane %v1301_v3, 6  ;;  %v1312_v47 = vrot.slane %v1301_v3, 7  ;;  %v2036_v3 = vld [vmem:[%s2911_s1 + $0xb0] sm:$0xff] }
 0x294   :  { %v1337_v36 = vsub.f32 %v2638_v8, %v1306_v19  ;;  %v1338_v18 = vsub.f32 %v2645_v23, %v1307_v25  ;;  %v1339_v17 = vsub.f32 %v2652_v7, %v1308_v39  ;;  %v1340_v30 = vsub.f32 %v2656_v4, %v1309_v31  ;;  %v2037_v19 = vld [vmem:[%s2911_s1 + $0xa8] sm:$0xff]  ;;  %v2038_v25 = vld [vmem:[%s2911_s1 + $0xa0] sm:$0xff]  ;;  %v2039_v39 = vld [vmem:[%s2911_s1 + $0x98] sm:$0xff] }
 0x295   :  { %v1352_v13 = vmul.f32 1.442695, %v1336_v15  ;;  %v1341_v35 = vsub.f32 %v2662_v20, %v1310_v41  ;;  %v1342_v42 = vsub.f32 %v2682_v58, %v1311_v29  ;;  %v1343_v21 = vsub.f32 %v2678_v52, %v1312_v47  ;;  %v2040_v31 = vld [vmem:[%s2911_s1 + $0x90] sm:$0xff]  ;;  %v2041_v15 = vld [vmem:[%s2911_s1 + $0x88] sm:$0xff]  ;;  %v2042_v41 = vld [vmem:[%s2911_s1 + $0x80] sm:$0xff]  ;;  %s2068_s1 = smov [#allocation2]  }
 0x296   :  { %v1354_v49 = vmul.f32 1.442695, %v1337_v36  ;;  %v1356_v60 = vmul.f32 1.442695, %v1338_v18  ;;  %v1358_v16 = vmul.f32 1.442695, %v1339_v17 }
 0x297   :  { %1983 = vpow2.f32 %v1352_v13  ;;  %v1360_v33 = vmul.f32 1.442695, %v1340_v30  ;;  %v1362_v8 = vmul.f32 1.442695, %v1341_v35  ;;  %v1364_v23 = vmul.f32 1.442695, %v1342_v42 }
 0x298   :  { %1985 = vpow2.f32 %v1354_v49  ;;  %v1366_v7 = vmul.f32 1.442695, %v1343_v21  ;;  %s1585_s18 = sshll.u32 %s2068_s1, 4  ;;  %s1586_s18 = int_to_ptr.vmem [resolvable:$true] %s1585_s18 }
 0x299   :  { %1987 = vpow2.f32 %v1356_v60  ;;  %s2043_s19 = scalar_lea.vmem %s1586_s18, 256  ;;  %p2048_p1 = scmp.lt.s32.totalorder %s1586_s18, %s1586_s18 }
 0x29a   :  { %1989 = vpow2.f32 %v1358_v16  ;;  %p2044_p0 = scmp.ne.s32.totalorder %s1586_s18, %s2043_s19  ;;  %p2049_p2 = scmp.lt.s32.totalorder %s2043_s19, %s2043_s19 }
 0x29b   :  { %1991 = vpow2.f32 %v1360_v33 }
 0x29c   :  { %1993 = vpow2.f32 %v1362_v8  ;;  %p2050_p3 = por %p2049_p2, %p2048_p1 }
 0x29d   :  { %1995 = vpow2.f32 %v1364_v23 }
 0x29e   :  { %1997 = vpow2.f32 %v1366_v7  ;;  %p2051_p4 = pnand %p2050_p3, %p2044_p0 }
 0x2a4   :  { %v1984_v4 = vpop.eup %1983 }
 0x2a5   :  { %v1986_v20 = vpop.eup %1985 }
 0x2a6   :  { %v1988_v58 = vpop.eup %1987  ;;  %v1400_v11 = vrot.slane %v1986_v20, 7 }
 0x2a7   :  { %v1990_v55 = vpop.eup %1989  ;;  %v1402_v0 = vrot.slane %v1988_v58, 6 }
 0x2a8   :  { %v1992_v52 = vpop.eup %1991  ;;  %v1401_v51 = vsel %vm1264_vm1, %v1400_v11, %v1984_v4  ;;  %v1404_v32 = vrot.slane %v1990_v55, 5 }
 0x2a9   :  { %v1994_v53 = vpop.eup %1993  ;;  %v1403_v9 = vsel %vm1267_vm2, %v1402_v0, %v1401_v51  ;;  %v1406_v46 = vrot.slane %v1992_v52, 4 }
 0x2aa   :  { %v1996_v14 = vpop.eup %1995  ;;  %v1405_v2 = vsel %vm1270_vm3, %v1404_v32, %v1403_v9  ;;  %v1408_v10 = vrot.slane %v1994_v53, 3 }
 0x2ab   :  { %v1998_v54 = vpop.eup %1997  ;;  %v1407_v40 = vsel %vm1273_vm4, %v1406_v46, %v1405_v2  ;;  %v1410_v50 = vrot.slane %v1996_v14, 2 }
 0x2ac   :  { %v1409_v43 = vsel %vm1276_vm5, %v1408_v10, %v1407_v40  ;;  %v1412_v57 = vrot.slane %v1998_v54, 1 }
 0x2ad   :  { %v1411_v27 = vsel %vm1279_vm6, %v1410_v50, %v1409_v43 }
 0x2ae   :  { %v1413_v61 = vsel %vm1282_vm7, %v1412_v57, %v1411_v27 }
 0x2af   :  { %1810 = vmatmul.mubr.f32.vlgmr.msra.gmra.mxu0 %v1413_v61  ;;  %1430 = vadd.xlane.f32.xlu1 %v1413_v61 }
 0x2b0   :  { %1813 = vmatpush3.msra.mxu0 %v2027_v48  ;;  %1844 = vmatprep.mubr.msk.f32.mxu0 %vm2067_vm8, %v2066_v12 }
 0x2b1   :  { %1814 = vmatprep.subr.mxu0 %v2066_v12 }
 0x2b2   :  { %1815 = vmatpush3.msra.mxu0 %v2028_v26 }
 0x2b3   :  { %1816 = vmatprep.subr.mxu0 %v2066_v12 }
 0x2b4   :  { %1817 = vmatpush3.msra.mxu0 %v2029_v6 }
 0x2b5   :  { %1818 = vmatprep.subr.mxu0 %v2066_v12 }
 0x2b6   :  { %1819 = vmatpush3.msra.mxu0 %v2030_v37 }
 0x2b7   :  { %1820 = vmatprep.subr.mxu0 %v2066_v12 }
 0x2b8   :  { %1821 = vmatpush3.msra.mxu0 %v2031_v59 }
 0x2b9   :  { %1822 = vmatprep.subr.mxu0 %v2066_v12 }
 0x2ba   :  { %1823 = vmatpush3.msra.mxu0 %v2032_v22 }
 0x2bb   :  { %1824 = vmatprep.subr.mxu0 %v2066_v12 }
 0x2bc   :  { %1825 = vmatpush3.msra.mxu0 %v2033_v24 }
 0x2bd   :  { %1826 = vmatprep.subr.mxu0 %v2066_v12 }
 0x2be   :  { %1827 = vmatpush3.msra.mxu0 %v2034_v63 }
 0x2bf   :  { %1828 = vmatprep.subr.mxu0 %v2066_v12 }
 0x2c0   :  { %1829 = vmatpush3.msra.mxu0 %v2035_v5 }
 0x2c1   :  { %1830 = vmatprep.subr.mxu0 %v2066_v12 }
 0x2c2   :  { %1831 = vmatpush3.msra.mxu0 %v2036_v3 }
 0x2c3   :  { %1832 = vmatprep.subr.mxu0 %v2066_v12 }
 0x2c4   :  { %1833 = vmatpush3.msra.mxu0 %v2037_v19 }
 0x2c5   :  { %1834 = vmatprep.subr.mxu0 %v2066_v12 }
 0x2c6   :  { %1835 = vmatpush3.msra.mxu0 %v2038_v25 }
 0x2c7   :  { %1836 = vmatprep.subr.mxu0 %v2066_v12 }
 0x2c8   :  { %1837 = vmatpush3.msra.mxu0 %v2039_v39 }
 0x2c9   :  { %1838 = vmatprep.subr.mxu0 %v2066_v12 }
 0x2ca   :  { %1839 = vmatpush3.msra.mxu0 %v2040_v31 }
 0x2cb   :  { %1840 = vmatprep.subr.mxu0 %v2066_v12 }
 0x2cc   :  { %1841 = vmatpush3.msra.mxu0 %v2041_v15 }
 0x2cd   :  { %1842 = vmatprep.subr.mxu0 %v2066_v12 }
 0x2ce   :  { %1843 = vmatpush3.msra.mxu0 %v2042_v41 }
 0x2ef   :  { %v1303_v29 = vpop.xlane.xlu1 %1302 }
 0x2f0   :  { %v1313_v47 = vrot.slane %v1303_v29, 1  ;;  %v1314_v36 = vrot.slane %v1303_v29, 2  ;;  %v1315_v18 = vrot.slane %v1303_v29, 3  ;;  %v1344_v17 = vsub.f32 %v2781_v28, %v1303_v29 }
 0x2f1   :  { %v1316_v30 = vrot.slane %v1303_v29, 4  ;;  %v1317_v13 = vrot.slane %v1303_v29, 5  ;;  %v1318_v35 = vrot.slane %v1303_v29, 6  ;;  %v1319_v42 = vrot.slane %v1303_v29, 7 }
 0x2f2   :  { %v1345_v49 = vsub.f32 %v2779_v38, %v1313_v47  ;;  %v1368_v60 = vmul.f32 1.442695, %v1344_v17  ;;  %v1346_v12 = vsub.f32 %v2783_v44, %v1314_v36  ;;  %v1347_v21 = vsub.f32 %v2785_v45, %v1315_v18 }
 0x2f3   :  { %v1348_v16 = vsub.f32 %v2788_v56, %v1316_v30  ;;  %v1349_v33 = vsub.f32 %v2791_v34, %v1317_v13  ;;  %v1350_v8 = vsub.f32 %v2796_v1, %v1318_v35  ;;  %v1351_v28 = vsub.f32 %v2800_v62, %v1319_v42 }
 0x2f4   :  { %v1370_v23 = vmul.f32 1.442695, %v1345_v49  ;;  %v1372_v7 = vmul.f32 1.442695, %v1346_v12  ;;  %v1374_v4 = vmul.f32 1.442695, %v1347_v21  ;;  %1999 = vpow2.f32 %v1368_v60 }
 0x2f5   :  { %v1376_v20 = vmul.f32 1.442695, %v1348_v16  ;;  %v1378_v38 = vmul.f32 1.442695, %v1349_v33  ;;  %v1380_v58 = vmul.f32 1.442695, %v1350_v8 }
 0x2f6   :  { %2001 = vpow2.f32 %v1370_v23  ;;  %v1382_v44 = vmul.f32 1.442695, %v1351_v28 }
 0x2f7   :  { %2003 = vpow2.f32 %v1372_v7 }
 0x2f8   :  { %2005 = vpow2.f32 %v1374_v4 }
 0x2f9   :  { %2007 = vpow2.f32 %v1376_v20 }
 0x2fa   :  { %2009 = vpow2.f32 %v1378_v38 }
 0x2fb   :  { %2011 = vpow2.f32 %v1380_v58 }
 0x2fc   :  { %2013 = vpow2.f32 %v1382_v44 }
 0x301   :  { %v2000_v45 = vpop.eup %1999 }
 0x303   :  { %v2002_v56 = vpop.eup %2001 }
 0x304   :  { %v2004_v34 = vpop.eup %2003  ;;  %v1414_v1 = vrot.slane %v2002_v56, 7 }
 0x305   :  { %v2006_v11 = vpop.eup %2005  ;;  %v1416_v62 = vrot.slane %v2004_v34, 6 }
 0x306   :  { %v2008_v55 = vpop.eup %2007  ;;  %v1415_v0 = vsel %vm1264_vm1, %v1414_v1, %v2000_v45  ;;  %v1418_v52 = vrot.slane %v2006_v11, 5 }
 0x307   :  { %v2010_v51 = vpop.eup %2009  ;;  %v1417_v32 = vsel %vm1267_vm2, %v1416_v62, %v1415_v0  ;;  %v1420_v53 = vrot.slane %v2008_v55, 4 }
 0x308   :  { %v2012_v9 = vpop.eup %2011  ;;  %v1419_v46 = vsel %vm1270_vm3, %v1418_v52, %v1417_v32  ;;  %v1422_v14 = vrot.slane %v2010_v51, 3 }
 0x309   :  { %v2014_v2 = vpop.eup %2013  ;;  %v1421_v10 = vsel %vm1273_vm4, %v1420_v53, %v1419_v46  ;;  %v1424_v54 = vrot.slane %v2012_v9, 2 }
 0x30a   :  { %v1423_v40 = vsel %vm1276_vm5, %v1422_v14, %v1421_v10  ;;  %v1426_v50 = vrot.slane %v2014_v2, 1 }
 0x30b   :  { %v1425_v43 = vsel %vm1279_vm6, %v1424_v54, %v1423_v40 }
 0x30c   :  { %v1427_v57 = vsel %vm1282_vm7, %v1426_v50, %v1425_v43 }
 0x30d   :  { %1432 = vadd.xlane.f32.xlu1 %v1427_v57  ;;  %1845 = vmatmul.mubr.f32.vlgmr.msra.gmra.mxu0 %v1427_v57 }
 0x338   :  { %v1431_v27 = vpop.xlane.xlu1 %1430 }
 0x339   :  { %2015 = vrcp.f32 %v1431_v27 }
 0x346   :  { %v2016_v61 = vpop.eup %2015 }
 0x36f   :  { %v1500_v48 = vpop.f32.mrf.mxu0 }
 0x370   :  { %v1576_v26 = vmul.f32 %v2016_v61, %v1500_v48 }
 0x371   :  { %v1811_v6 = vpop.f32.mrf.mxu0 }
 0x372   :  { %1578 = vst.msk [vmem:[#allocation2] sm:$0xff] %vm43_vm0, %v1576_v26 }
 0x396   :  { %v1433_v37 = vpop.xlane.xlu1 %1432 }
 0x397   :  { %2017 = vrcp.f32 %v1433_v37 }
 0x3a4   :  { %v2018_v59 = vpop.eup %2017 }
 0x3cd   :  { %v1570_v22 = vpop.f32.mrf.mxu0 }
 0x3ce   :  { %v1577_v24 = vmul.f32 %v2018_v59, %v1570_v22 }
 0x3cf   :  { %v1846_v63 = vpop.f32.mrf.mxu0 }
 0x3d0   :  { %1579 = vst.msk [vmem:[#allocation2 + $0x8] sm:$0xff] %vm43_vm0, %v1577_v24 }
 0x3d1   :  { %2054 = shalt.err (!%p2051_p4)
}
 0x3d2   :  { %s2069_s20 = smov 128   ;;  %s2070_s21 = smov 8  }
 0x3d3   :  { %1591 = dma.vmem_to_hbm [thread:$0]  %s1586_s18, 256, %s2918_s8, [#allocation3], %s2069_s20, %s2069_s20, %s2070_s21  }
 0x3d4   :  { %2063 = dma.done.wait [#allocation3], 256  }
 0x3d5   :  { %2064 = vsyncadd [#allocation3], 4294967040 }
 0x3d6   :  { %1595 = vsyncpa [#allocation3], 1 }

</bundles_post_ra>
